<compile_context>
chip_gen: v7x
topology: tpu7x:2x2x1
jax: 0.10.0
libtpu: 0.0.40
codegen_flags: <defaults>
</compile_context>

<pallas_src>
import jax
import jax.numpy as jnp
import numpy as np
from jax.experimental import pallas as pl
from jax.experimental.pallas import tpu as pltpu

TILE_B = 256  # batch rows per grid step (>=256 for v6e/v7x MXU, >=128 for v5e)


def critic_kernel(x_ref, a_ref, g_ref, beta_ref,
                  w1_ref, b1_ref,
                  w2_ref, b2_ref,
                  w3_ref, b3_ref,
                  out_ref):
    # ---- net1: LayerNorm over features (biased var, eps=1e-5), then fc1 ----
    x = x_ref[...].astype(jnp.float32)
    mu = jnp.mean(x, axis=-1, keepdims=True)
    xc = x - mu
    var = jnp.mean(xc * xc, axis=-1, keepdims=True)
    xln = (xc * jax.lax.rsqrt(var + 1e-5)) * g_ref[...] + beta_ref[...]

    o = jnp.dot(xln.astype(jnp.bfloat16), w1_ref[...],
                preferred_element_type=jnp.float32) + b1_ref[...]

    # ---- net2: ReLU(cat(o, a)) -> fc2 -> ReLU -> fc3 ----
    o_r = jnp.maximum(o, 0.0)
    a_r = jnp.maximum(a_ref[...].astype(jnp.float32), 0.0)
    cat_r = jnp.concatenate([o_r, a_r], axis=-1)          # (TILE_B, hid1+act_feat)

    h = jnp.dot(cat_r.astype(jnp.bfloat16), w2_ref[...],
                preferred_element_type=jnp.float32) + b2_ref[...]
    h = jnp.maximum(h, 0.0)

    # Final head has N=1: use VPU multiply + XLU lane-reduce, not an MXU pass.
    q = jnp.sum(h * w3_ref[...], axis=-1, keepdims=True) + b3_ref[...]
    out_ref[...] = q.astype(out_ref.dtype)


@jax.jit
def critic_forward(x, a, params):
    """x: (B, obs_size*num_agents), a: (B, act_size*num_agents) -> (B, 1)."""
    gamma, beta, w1, b1, w2, b2, w3_row, b3 = params
    B = x.shape[0]
    obs_feat = x.shape[1]
    act_feat = a.shape[1]

    # Pad batch up to a multiple of TILE_B (zero rows are harmless: LN of a
    # zero row stays finite, and padded outputs are sliced off below).
    B_pad = ((B + TILE_B - 1) // TILE_B) * TILE_B
    if B_pad != B:
        x = jnp.pad(x, ((0, B_pad - B), (0, 0)))
        a = jnp.pad(a, ((0, B_pad - B), (0, 0)))

    def batch_tiled(feat):
        return pl.BlockSpec((TILE_B, feat), lambda i: (i, 0))

    def resident(arr):  # whole array as one block, same block every step
        return pl.BlockSpec(arr.shape, lambda i: (0, 0))

    in_specs = [
        batch_tiled(obs_feat),           # x
        batch_tiled(act_feat),           # a
        resident(gamma), resident(beta),
        resident(w1), resident(b1),
        resident(w2), resident(b2),
        resident(w3_row), resident(b3),
    ]

    out = pl.pallas_call(
        critic_kernel,
        out_shape=jax.ShapeDtypeStruct((B_pad, 1), jnp.float32),
        grid=(B_pad // TILE_B,),
        in_specs=in_specs,
        out_specs=pl.BlockSpec((TILE_B, 1), lambda i: (i, 0)),
        compiler_params=pltpu.CompilerParams(
            dimension_semantics=("parallel",)),
    )(x, a, gamma, beta, w1, b1, w2, b2, w3_row, b3)
    return out[:B]


def init_params(key, obs_feat, act_feat, hid1, hid2):
    """PyTorch-style init. Matmul weights stored pre-transposed (in, out) bf16."""
    ks = jax.random.split(key, 6)

    def lin(kw, kb, fan_in, fan_out):
        bound = 1.0 / np.sqrt(fan_in)
        w = jax.random.uniform(kw, (fan_in, fan_out), jnp.float32, -bound, bound)
        b = jax.random.uniform(kb, (1, fan_out), jnp.float32, -bound, bound)
        return w, b

    gamma = jnp.ones((1, obs_feat), jnp.float32)   # LayerNorm weight
    beta = jnp.zeros((1, obs_feat), jnp.float32)   # LayerNorm bias

    w1, b1 = lin(ks[0], ks[1], obs_feat, hid1)
    w2, b2 = lin(ks[2], ks[3], hid1 + act_feat, hid2)
    w3, b3 = lin(ks[4], ks[5], hid2, 1)
    w3_row = w3.T                                   # (1, hid2) for the VPU head
    return (gamma, beta,
            w1.astype(jnp.bfloat16), b1,
            w2.astype(jnp.bfloat16), b2,
            w3_row, b3)


def reference_forward(x, a, params):
    """Pure-JAX reference mirroring the PyTorch module (same bf16 matmul inputs)."""
    gamma, beta, w1, b1, w2, b2, w3_row, b3 = params
    mu = jnp.mean(x, axis=-1, keepdims=True)
    var = jnp.mean((x - mu) ** 2, axis=-1, keepdims=True)
    xln = (x - mu) / jnp.sqrt(var + 1e-5) * gamma + beta
    o = jnp.dot(xln.astype(jnp.bfloat16), w1,
                preferred_element_type=jnp.float32) + b1
    cat = jnp.concatenate([jnp.maximum(o, 0.0), jnp.maximum(a, 0.0)], axis=1)
    h = jnp.dot(cat.astype(jnp.bfloat16), w2,
                preferred_element_type=jnp.float32) + b2
    h = jnp.maximum(h, 0.0)
    return jnp.sum(h * w3_row, axis=-1, keepdims=True) + b3


if __name__ == "__main__":
    # Small, forward-consistent shapes; batch 500 pads to 512 -> 2 grid steps.
    batch = 500
    obs_size, act_size, num_agents = 32, 16, 2
    hid1, hid2 = 128, 128
    obs_feat = obs_size * num_agents   # 64
    act_feat = act_size * num_agents   # 32

    key = jax.random.PRNGKey(0)
    kx, ka, kp = jax.random.split(key, 3)
    x = jax.random.normal(kx, (batch, obs_feat), jnp.float32)
    a = jax.random.uniform(ka, (batch, act_feat), jnp.float32, -1.0, 1.0)

    params = init_params(kp, obs_feat, act_feat, hid1, hid2)

    q = jax.block_until_ready(critic_forward(x, a, params))
    q_ref = reference_forward(x, a, params)

    assert q.shape == (batch, 1)
    np.testing.assert_allclose(np.asarray(q), np.asarray(q_ref),
                               rtol=1e-3, atol=1e-3)
    print("KERNEL_OK")
</pallas_src>

<mosaic_0001>
module attributes {stable_mosaic.version = 11 : i64} {
  func.func @critic_kernel(%arg0: i32, %arg1: memref<256x64xf32, #tpu.memory_space<vmem>>, %arg2: memref<256x32xf32, #tpu.memory_space<vmem>>, %arg3: memref<1x64xf32, #tpu.memory_space<vmem>>, %arg4: memref<1x64xf32, #tpu.memory_space<vmem>>, %arg5: memref<64x128xbf16, #tpu.memory_space<vmem>>, %arg6: memref<1x128xf32, #tpu.memory_space<vmem>>, %arg7: memref<160x128xbf16, #tpu.memory_space<vmem>>, %arg8: memref<1x128xf32, #tpu.memory_space<vmem>>, %arg9: memref<1x128xf32, #tpu.memory_space<vmem>>, %arg10: memref<1x1xf32, #tpu.memory_space<vmem>>, %arg11: memref<256x1xf32, #tpu.memory_space<vmem>>) attributes {dimension_semantics = [#tpu.dimension_semantics<parallel>], iteration_bounds = array<i64: 2>, scalar_prefetch = 0 : i64, scratch_operands = 0 : i64, tpu.core_type = #tpu.core_type<tc>, window_params = [{transform_indices = @transform_0, window_bounds = array<i64: 256, 64>}, {transform_indices = @transform_1, window_bounds = array<i64: 256, 32>}, {pipeline_mode = #tpu.pipeline_mode<synchronous>, transform_indices = @transform_2, window_bounds = array<i64: 1, 64>}, {pipeline_mode = #tpu.pipeline_mode<synchronous>, transform_indices = @transform_3, window_bounds = array<i64: 1, 64>}, {pipeline_mode = #tpu.pipeline_mode<synchronous>, transform_indices = @transform_4, window_bounds = array<i64: 64, 128>}, {pipeline_mode = #tpu.pipeline_mode<synchronous>, transform_indices = @transform_5, window_bounds = array<i64: 1, 128>}, {pipeline_mode = #tpu.pipeline_mode<synchronous>, transform_indices = @transform_6, window_bounds = array<i64: 160, 128>}, {pipeline_mode = #tpu.pipeline_mode<synchronous>, transform_indices = @transform_7, window_bounds = array<i64: 1, 128>}, {pipeline_mode = #tpu.pipeline_mode<synchronous>, transform_indices = @transform_8, window_bounds = array<i64: 1, 128>}, {pipeline_mode = #tpu.pipeline_mode<synchronous>, transform_indices = @transform_9, window_bounds = array<i64: 1, 1>}, {transform_indices = @transform_10, window_bounds = array<i64: 256, 1>}]} {
    %c0 = arith.constant 0 : index
    %c0_0 = arith.constant 0 : index
    %0 = vector.load %arg1[%c0, %c0_0] : memref<256x64xf32, #tpu.memory_space<vmem>>, vector<256x64xf32>
    %cst = arith.constant dense<0.000000e+00> : vector<256xf32>
    %1 = vector.multi_reduction <add>, %0, %cst [1] : vector<256x64xf32> to vector<256xf32>
    %2 = vector.shape_cast %1 : vector<256xf32> to vector<256x1xf32>
    %cst_1 = arith.constant 6.400000e+01 : f32
    %3 = vector.broadcast %cst_1 : f32 to vector<256x1xf32>
    %4 = arith.divf %2, %3 : vector<256x1xf32>
    %5 = vector.broadcast %4 : vector<256x1xf32> to vector<256x64xf32>
    %6 = arith.subf %0, %5 : vector<256x64xf32>
    %7 = arith.mulf %6, %6 : vector<256x64xf32>
    %cst_2 = arith.constant dense<0.000000e+00> : vector<256xf32>
    %8 = vector.multi_reduction <add>, %7, %cst_2 [1] : vector<256x64xf32> to vector<256xf32>
    %9 = vector.shape_cast %8 : vector<256xf32> to vector<256x1xf32>
    %cst_3 = arith.constant 6.400000e+01 : f32
    %10 = vector.broadcast %cst_3 : f32 to vector<256x1xf32>
    %11 = arith.divf %9, %10 : vector<256x1xf32>
    %cst_4 = arith.constant 9.99999974E-6 : f32
    %12 = vector.broadcast %cst_4 : f32 to vector<256x1xf32>
    %13 = arith.addf %11, %12 : vector<256x1xf32>
    %14 = math.rsqrt %13 : vector<256x1xf32>
    %15 = vector.broadcast %14 : vector<256x1xf32> to vector<256x64xf32>
    %16 = arith.mulf %6, %15 : vector<256x64xf32>
    %c0_5 = arith.constant 0 : index
    %c0_6 = arith.constant 0 : index
    %17 = vector.load %arg3[%c0_5, %c0_6] : memref<1x64xf32, #tpu.memory_space<vmem>>, vector<1x64xf32>
    %18 = vector.broadcast %17 : vector<1x64xf32> to vector<256x64xf32>
    %19 = arith.mulf %16, %18 : vector<256x64xf32>
    %c0_7 = arith.constant 0 : index
    %c0_8 = arith.constant 0 : index
    %20 = vector.load %arg4[%c0_7, %c0_8] : memref<1x64xf32, #tpu.memory_space<vmem>>, vector<1x64xf32>
    %21 = vector.broadcast %20 : vector<1x64xf32> to vector<256x64xf32>
    %22 = arith.addf %19, %21 : vector<256x64xf32>
    %23 = arith.truncf %22 : vector<256x64xf32> to vector<256x64xbf16>
    %c0_9 = arith.constant 0 : index
    %c0_10 = arith.constant 0 : index
    %24 = vector.load %arg5[%c0_9, %c0_10] : memref<64x128xbf16, #tpu.memory_space<vmem>>, vector<64x128xbf16>
    %cst_11 = arith.constant dense<0.000000e+00> : vector<256x128xf32>
    %25 = tpu.matmul %23, %24, %cst_11 {dimension_numbers = #tpu.dot_dimension_numbers<[1], [0], [0], [1], [0, 0, 1, 1], [], []>} : vector<256x64xbf16>, vector<64x128xbf16>, vector<256x128xf32> -> vector<256x128xf32>
    %c0_12 = arith.constant 0 : index
    %c0_13 = arith.constant 0 : index
    %26 = vector.load %arg6[%c0_12, %c0_13] : memref<1x128xf32, #tpu.memory_space<vmem>>, vector<1x128xf32>
    %27 = vector.broadcast %26 : vector<1x128xf32> to vector<256x128xf32>
    %28 = arith.addf %25, %27 : vector<256x128xf32>
    %cst_14 = arith.constant 0.000000e+00 : f32
    %29 = vector.broadcast %cst_14 : f32 to vector<256x128xf32>
    %30 = arith.maximumf %28, %29 : vector<256x128xf32>
    %c0_15 = arith.constant 0 : index
    %c0_16 = arith.constant 0 : index
    %31 = vector.load %arg2[%c0_15, %c0_16] : memref<256x32xf32, #tpu.memory_space<vmem>>, vector<256x32xf32>
    %cst_17 = arith.constant 0.000000e+00 : f32
    %32 = vector.broadcast %cst_17 : f32 to vector<256x32xf32>
    %33 = arith.maximumf %31, %32 : vector<256x32xf32>
    %34 = tpu.concatenate %30, %33 in 1 : vector<256x128xf32>, vector<256x32xf32> -> vector<256x160xf32>
    %35 = arith.truncf %34 : vector<256x160xf32> to vector<256x160xbf16>
    %c0_18 = arith.constant 0 : index
    %c0_19 = arith.constant 0 : index
    %36 = vector.load %arg7[%c0_18, %c0_19] : memref<160x128xbf16, #tpu.memory_space<vmem>>, vector<160x128xbf16>
    %cst_20 = arith.constant dense<0.000000e+00> : vector<256x128xf32>
    %37 = tpu.matmul %35, %36, %cst_20 {dimension_numbers = #tpu.dot_dimension_numbers<[1], [0], [0], [1], [0, 0, 1, 1], [], []>} : vector<256x160xbf16>, vector<160x128xbf16>, vector<256x128xf32> -> vector<256x128xf32>
    %c0_21 = arith.constant 0 : index
    %c0_22 = arith.constant 0 : index
    %38 = vector.load %arg8[%c0_21, %c0_22] : memref<1x128xf32, #tpu.memory_space<vmem>>, vector<1x128xf32>
    %39 = vector.broadcast %38 : vector<1x128xf32> to vector<256x128xf32>
    %40 = arith.addf %37, %39 : vector<256x128xf32>
    %cst_23 = arith.constant 0.000000e+00 : f32
    %41 = vector.broadcast %cst_23 : f32 to vector<256x128xf32>
    %42 = arith.maximumf %40, %41 : vector<256x128xf32>
    %c0_24 = arith.constant 0 : index
    %c0_25 = arith.constant 0 : index
    %43 = vector.load %arg9[%c0_24, %c0_25] : memref<1x128xf32, #tpu.memory_space<vmem>>, vector<1x128xf32>
    %44 = vector.broadcast %43 : vector<1x128xf32> to vector<256x128xf32>
    %45 = arith.mulf %42, %44 : vector<256x128xf32>
    %cst_26 = arith.constant dense<0.000000e+00> : vector<256xf32>
    %46 = vector.multi_reduction <add>, %45, %cst_26 [1] : vector<256x128xf32> to vector<256xf32>
    %47 = vector.shape_cast %46 : vector<256xf32> to vector<256x1xf32>
    %c0_27 = arith.constant 0 : index
    %c0_28 = arith.constant 0 : index
    %48 = vector.load %arg10[%c0_27, %c0_28] : memref<1x1xf32, #tpu.memory_space<vmem>>, vector<1x1xf32>
    %49 = vector.broadcast %48 : vector<1x1xf32> to vector<256x1xf32>
    %50 = arith.addf %47, %49 : vector<256x1xf32>
    %c0_29 = arith.constant 0 : index
    %c0_30 = arith.constant 0 : index
    %51 = vector.load %arg11[%c0_29, %c0_30] : memref<256x1xf32, #tpu.memory_space<vmem>>, vector<256x1xf32>
    tpu.vector_store %arg11[%c0_29, %c0_30], %50 {strides = array<i32>} : memref<256x1xf32, #tpu.memory_space<vmem>>, vector<256x1xf32>,
    return
  }
  func.func @transform_0(%arg0: i32) -> (i32, i32) {
    %c0_i32 = arith.constant 0 : i32
    %c0_i32_0 = arith.constant 0 : i32
    return %arg0, %c0_i32 : i32, i32
  }
  func.func @transform_1(%arg0: i32) -> (i32, i32) {
    %c0_i32 = arith.constant 0 : i32
    %c0_i32_0 = arith.constant 0 : i32
    return %arg0, %c0_i32 : i32, i32
  }
  func.func @transform_2(%arg0: i32) -> (i32, i32) {
    %c0_i32 = arith.constant 0 : i32
    %c0_i32_0 = arith.constant 0 : i32
    %c0_i32_1 = arith.constant 0 : i32
    return %c0_i32, %c0_i32_0 : i32, i32
  }
  func.func @transform_3(%arg0: i32) -> (i32, i32) {
    %c0_i32 = arith.constant 0 : i32
    %c0_i32_0 = arith.constant 0 : i32
    %c0_i32_1 = arith.constant 0 : i32
    return %c0_i32, %c0_i32_0 : i32, i32
  }
  func.func @transform_4(%arg0: i32) -> (i32, i32) {
    %c0_i32 = arith.constant 0 : i32
    %c0_i32_0 = arith.constant 0 : i32
    %c0_i32_1 = arith.constant 0 : i32
    return %c0_i32, %c0_i32_0 : i32, i32
  }
  func.func @transform_5(%arg0: i32) -> (i32, i32) {
    %c0_i32 = arith.constant 0 : i32
    %c0_i32_0 = arith.constant 0 : i32
    %c0_i32_1 = arith.constant 0 : i32
    return %c0_i32, %c0_i32_0 : i32, i32
  }
  func.func @transform_6(%arg0: i32) -> (i32, i32) {
    %c0_i32 = arith.constant 0 : i32
    %c0_i32_0 = arith.constant 0 : i32
    %c0_i32_1 = arith.constant 0 : i32
    return %c0_i32, %c0_i32_0 : i32, i32
  }
  func.func @transform_7(%arg0: i32) -> (i32, i32) {
    %c0_i32 = arith.constant 0 : i32
    %c0_i32_0 = arith.constant 0 : i32
    %c0_i32_1 = arith.constant 0 : i32
    return %c0_i32, %c0_i32_0 : i32, i32
  }
  func.func @transform_8(%arg0: i32) -> (i32, i32) {
    %c0_i32 = arith.constant 0 : i32
    %c0_i32_0 = arith.constant 0 : i32
    %c0_i32_1 = arith.constant 0 : i32
    return %c0_i32, %c0_i32_0 : i32, i32
  }
  func.func @transform_9(%arg0: i32) -> (i32, i32) {
    %c0_i32 = arith.constant 0 : i32
    %c0_i32_0 = arith.constant 0 : i32
    %c0_i32_1 = arith.constant 0 : i32
    return %c0_i32, %c0_i32_0 : i32, i32
  }
  func.func @transform_10(%arg0: i32) -> (i32, i32) {
    %c0_i32 = arith.constant 0 : i32
    %c0_i32_0 = arith.constant 0 : i32
    return %arg0, %c0_i32 : i32, i32
  }
}

</mosaic_0001>

<bundles_post_ra>
// kernel: critic_forward.1
= control target key start
LH: loop header
LB: loop body
LE: loop exit
PB: predicated region body
PF: predicated region fallthrough
CT: control target
= control target key end

     0   :  { %s2179_s15 = smov 0   ;;  %s3038_s0 = inlined_call_operand.vmem [shape: f32[512,64], index: 0, kind: input, shape index: {}]   ;;  %s3039_s1 = inlined_call_operand.vmem [shape: f32[512,32], index: 1, kind: input, shape index: {}]   ;;  %s3040_s2 = inlined_call_operand.vmem [shape: f32[1,64], index: 2, kind: input, shape index: {}]   ;;  %s3041_s3 = inlined_call_operand.vmem [shape: f32[1,64], index: 3, kind: input, shape index: {}]   ;;  %s3042_s4 = inlined_call_operand.vmem [shape: bf16[64,128], index: 4, kind: input, shape index: {}]   ;;  %s3043_s5 = inlined_call_operand.vmem [shape: f32[1,128], index: 5, kind: input, shape index: {}]   ;;  %s3044_s6 = inlined_call_operand.vmem [shape: bf16[160,128], index: 6, kind: input, shape index: {}]   ;;  %s3045_s7 = inlined_call_operand.vmem [shape: f32[1,128], index: 7, kind: input, shape index: {}]   ;;  %s3046_s8 = inlined_call_operand.vmem [shape: f32[1,128], index: 8, kind: input, shape index: {}]   ;;  %s3047_s9 = inlined_call_operand.<no memory space> [shape: f32[1,1], index: 9, kind: input, shape index: {}]   ;;  %s3048_s10 = inlined_call_operand.vmem [shape: f32[512,1], index: 10, kind: output, shape index: {}]  }
   0x1   :  { %v15_v0 = vstv %s3047_s9 }
   0x2   :  { %16 = vst [vmem:[#allocation2] sm:$0x1] %v15_v0 }
   0x3 LB: > { %s1880_s16 = sadd.s32 4294967295, %s2118_s15   ;;  %p1884_p0 = scmp.ge.s32.totalorder %s2118_s15, 1  ;;  %s2118_s15 = sphi %s2179_s15, %s22_s15  }
   0x4   : > { %p326_p1 = scmp.lt.s32.totalorder %s2118_s15, 3 }
   0x6   : > { %p327_p2 = pnand %p1884_p0, %p326_p1 }
   0x7   : > { %s1885_s17 = sshll.u32 (!%p327_p2), %s1880_s16, 5  ;;  %vm420_vm0 = vcmask (!%p327_p2), 523264   ;;  %vm1395_vm1 = vcmask (!%p327_p2), 261120   ;;  %vm1779_vm2 = vcmask (!%p327_p2), 7168  }
   0x8   : > { %330 = sbr.rel (%p327_p2) target bundleno = 1024 (0x400), region = 60  ;;  %p370_p3 = scmp.lt.s32.totalorder (!%p327_p2), %s1885_s17, 63 }
   0xf   : > { %s3050_s17 = smov (!%p370_p3, %s1885_s17), 63 }
  0x10   : > { %s2187_s9 = sshll.u32 %s3050_s17, 3 }
  0x11   : > { %s2193_s20 = scalar_lea.vmem %s3038_s0, %s2187_s9  ;;  %s2759_s12 = scalar_lea.vmem %s3039_s1, %s2187_s9 }
  0x12   : > { %v2196_v1 = vld [vmem:[%s2193_s20] sm:$0xff]  ;;  %v2199_v2 = vld [vmem:[%s2193_s20 + $0x10] sm:$0xff]  ;;  %v2202_v3 = vld [vmem:[%s2193_s20 + $0x8] sm:$0xff]  ;;  %s2937_s26 = scalar_lea.vmem %s3048_s10, %s2187_s9 }
  0x13   : > { %v421_v4 = vsel %vm420_vm0, %v2196_v1, 0.0  ;;  %v427_v5 = vsel %vm420_vm0, %v2199_v2, 0.0  ;;  %v2209_v6 = vld [vmem:[%s2193_s20 + $0x18] sm:$0xff]  ;;  %v424_v7 = vsel %vm420_vm0, %v2202_v3, 0.0  ;;  %v2216_v9 = vld [vmem:[%s2193_s20 + $0x20] sm:$0xff]  ;;  %v2219_v10 = vld [vmem:[%s2193_s20 + $0x28] sm:$0xff] }
  0x14   : > { %422 = vadd.xlane.f32.xlu0 %v421_v4  ;;  %428 = vadd.xlane.f32.xlu1 %v427_v5  ;;  %v430_v8 = vsel %vm420_vm0, %v2209_v6, 0.0  ;;  %v433_v11 = vsel %vm420_vm0, %v2216_v9, 0.0  ;;  %v436_v12 = vsel %vm420_vm0, %v2219_v10, 0.0  ;;  %v2226_v13 = vld [vmem:[%s2193_s20 + $0x30] sm:$0xff]  ;;  %v2229_v14 = vld [vmem:[%s2193_s20 + $0x38] sm:$0xff]  ;;  %v2234_v16 = vld [vmem:[%s2193_s20 + $0x40] sm:$0xff] }
  0x15   : > { %v439_v15 = vsel %vm420_vm0, %v2226_v13, 0.0  ;;  %v442_v17 = vsel %vm420_vm0, %v2229_v14, 0.0  ;;  %v2239_v18 = vld [vmem:[%s2193_s20 + $0x48] sm:$0xff]  ;;  %v445_v19 = vsel %vm420_vm0, %v2234_v16, 0.0  ;;  %v2246_v21 = vld [vmem:[%s2193_s20 + $0x50] sm:$0xff]  ;;  %v2249_v22 = vld [vmem:[%s2193_s20 + $0x58] sm:$0xff] }
  0x16   : > { %v448_v20 = vsel %vm420_vm0, %v2239_v18, 0.0  ;;  %v451_v23 = vsel %vm420_vm0, %v2246_v21, 0.0  ;;  %v454_v24 = vsel %vm420_vm0, %v2249_v22, 0.0  ;;  %v2256_v25 = vld [vmem:[%s2193_s20 + $0x60] sm:$0xff]  ;;  %v2259_v26 = vld [vmem:[%s2193_s20 + $0x68] sm:$0xff]  ;;  %v2266_v29 = vld [vmem:[%s2193_s20 + $0x70] sm:$0xff] }
  0x17   : > { %v457_v27 = vsel %vm420_vm0, %v2256_v25, 0.0  ;;  %v460_v28 = vsel %vm420_vm0, %v2259_v26, 0.0  ;;  %v2269_v30 = vld [vmem:[%s2193_s20 + $0x78] sm:$0xff]  ;;  %v463_v31 = vsel %vm420_vm0, %v2266_v29, 0.0  ;;  %v2276_v33 = vld [vmem:[%s2193_s20 + $0x80] sm:$0xff]  ;;  %v2279_v34 = vld [vmem:[%s2193_s20 + $0x88] sm:$0xff] }
  0x18   : > { %425 = vadd.xlane.f32.xlu0 %v424_v7  ;;  %431 = vadd.xlane.f32.xlu1 %v430_v8  ;;  %v466_v32 = vsel %vm420_vm0, %v2269_v30, 0.0  ;;  %v469_v35 = vsel %vm420_vm0, %v2276_v33, 0.0  ;;  %v472_v36 = vsel %vm420_vm0, %v2279_v34, 0.0  ;;  %v2286_v37 = vld [vmem:[%s2193_s20 + $0x90] sm:$0xff]  ;;  %v2289_v38 = vld [vmem:[%s2193_s20 + $0x98] sm:$0xff]  ;;  %v2296_v41 = vld [vmem:[%s2193_s20 + $0xa0] sm:$0xff] }
  0x19   : > { %v475_v39 = vsel %vm420_vm0, %v2286_v37, 0.0  ;;  %v478_v40 = vsel %vm420_vm0, %v2289_v38, 0.0  ;;  %v2299_v42 = vld [vmem:[%s2193_s20 + $0xa8] sm:$0xff]  ;;  %v481_v43 = vsel %vm420_vm0, %v2296_v41, 0.0  ;;  %v2306_v45 = vld [vmem:[%s2193_s20 + $0xb0] sm:$0xff]  ;;  %v2309_v46 = vld [vmem:[%s2193_s20 + $0xb8] sm:$0xff] }
  0x1a   : > { %v484_v44 = vsel %vm420_vm0, %v2299_v42, 0.0  ;;  %v487_v47 = vsel %vm420_vm0, %v2306_v45, 0.0  ;;  %v490_v48 = vsel %vm420_vm0, %v2309_v46, 0.0  ;;  %v2316_v49 = vld [vmem:[%s2193_s20 + $0xc0] sm:$0xff]  ;;  %v2319_v50 = vld [vmem:[%s2193_s20 + $0xc8] sm:$0xff]  ;;  %v2326_v53 = vld [vmem:[%s2193_s20 + $0xd0] sm:$0xff] }
  0x1b   : > { %v493_v51 = vsel %vm420_vm0, %v2316_v49, 0.0  ;;  %v496_v52 = vsel %vm420_vm0, %v2319_v50, 0.0  ;;  %v2329_v54 = vld [vmem:[%s2193_s20 + $0xd8] sm:$0xff]  ;;  %v499_v55 = vsel %vm420_vm0, %v2326_v53, 0.0  ;;  %v2336_v57 = vld [vmem:[%s2193_s20 + $0xe0] sm:$0xff]  ;;  %v2339_v58 = vld [vmem:[%s2193_s20 + $0xe8] sm:$0xff] }
  0x1c   : > { %434 = vadd.xlane.f32.xlu0 %v433_v11  ;;  %437 = vadd.xlane.f32.xlu1 %v436_v12  ;;  %v502_v56 = vsel %vm420_vm0, %v2329_v54, 0.0  ;;  %v505_v59 = vsel %vm420_vm0, %v2336_v57, 0.0  ;;  %v508_v60 = vsel %vm420_vm0, %v2339_v58, 0.0  ;;  %v2346_v61 = vld [vmem:[%s2193_s20 + $0xf0] sm:$0xff]  ;;  %v2349_v62 = vld [vmem:[%s2193_s20 + $0xf8] sm:$0xff] }
  0x1d   : > { %v511_v63 = vsel %vm420_vm0, %v2346_v61, 0.0  ;;  %v514_v0 = vsel %vm420_vm0, %v2349_v62, 0.0 }
  0x20   : > { %440 = vadd.xlane.f32.xlu0 %v439_v15  ;;  %443 = vadd.xlane.f32.xlu1 %v442_v17 }
  0x24   : > { %446 = vadd.xlane.f32.xlu0 %v445_v19  ;;  %449 = vadd.xlane.f32.xlu1 %v448_v20 }
  0x28   : > { %452 = vadd.xlane.f32.xlu0 %v451_v23  ;;  %455 = vadd.xlane.f32.xlu1 %v454_v24 }
  0x2c   : > { %458 = vadd.xlane.f32.xlu0 %v457_v27  ;;  %461 = vadd.xlane.f32.xlu1 %v460_v28 }
  0x30   : > { %464 = vadd.xlane.f32.xlu0 %v463_v31  ;;  %467 = vadd.xlane.f32.xlu1 %v466_v32 }
  0x34   : > { %470 = vadd.xlane.f32.xlu0 %v469_v35  ;;  %473 = vadd.xlane.f32.xlu1 %v472_v36 }
  0x38   : > { %476 = vadd.xlane.f32.xlu0 %v475_v39  ;;  %479 = vadd.xlane.f32.xlu1 %v478_v40 }
  0x3c   : > { %482 = vadd.xlane.f32.xlu0 %v481_v43  ;;  %485 = vadd.xlane.f32.xlu1 %v484_v44 }
  0x40   : > { %488 = vadd.xlane.f32.xlu0 %v487_v47  ;;  %491 = vadd.xlane.f32.xlu1 %v490_v48 }
  0x44   : > { %494 = vadd.xlane.f32.xlu0 %v493_v51  ;;  %497 = vadd.xlane.f32.xlu1 %v496_v52 }
  0x48   : > { %500 = vadd.xlane.f32.xlu0 %v499_v55  ;;  %503 = vadd.xlane.f32.xlu1 %v502_v56 }
  0x4c   : > { %506 = vadd.xlane.f32.xlu0 %v505_v59  ;;  %509 = vadd.xlane.f32.xlu1 %v508_v60 }
  0x50   : > { %512 = vadd.xlane.f32.xlu0 %v511_v63  ;;  %515 = vadd.xlane.f32.xlu1 %v514_v0 }
  0xa1   : > { %v423_v4 = vpop.xlane.xlu0 %422  ;;  %v429_v5 = vpop.xlane.xlu1 %428 }
  0xa2   : > { %v518_v7 = vmul.f32 0.015625, %v423_v4  ;;  %v520_v8 = vmul.f32 0.015625, %v429_v5 }
  0xa4   : > { %v2356_v11 = vsub.f32 %v2196_v1, %v518_v7  ;;  %v2359_v12 = vsub.f32 %v2199_v2, %v520_v8 }
  0xa5   : > { %v426_v15 = vpop.xlane.xlu0 %425  ;;  %v432_v17 = vpop.xlane.xlu1 %431 }
  0xa6   : > { %v519_v19 = vmul.f32 0.015625, %v426_v15  ;;  %v521_v20 = vmul.f32 0.015625, %v432_v17  ;;  %v582_v23 = vmul.f32 %v2356_v11, %v2356_v11  ;;  %v584_v24 = vmul.f32 %v2359_v12, %v2359_v12 }
  0xa8   : > { %v2366_v27 = vsub.f32 %v2202_v3, %v519_v19  ;;  %v2369_v28 = vsub.f32 %v2209_v6, %v521_v20  ;;  %v614_v1 = vsel %vm420_vm0, %v582_v23, 0.0  ;;  %v620_v32 = vsel %vm420_vm0, %v584_v24, 0.0 }
  0xa9   : > { %615 = vadd.xlane.f32.xlu0 %v614_v1  ;;  %v435_v2 = vpop.xlane.xlu0 %434  ;;  %v438_v31 = vpop.xlane.xlu1 %437 }
  0xaa   : > { %v522_v35 = vmul.f32 0.015625, %v435_v2  ;;  %v523_v36 = vmul.f32 0.015625, %v438_v31  ;;  %v583_v39 = vmul.f32 %v2366_v27, %v2366_v27  ;;  %v585_v40 = vmul.f32 %v2369_v28, %v2369_v28 }
  0xac   : > { %v2378_v3 = vsub.f32 %v2216_v9, %v522_v35  ;;  %v2381_v6 = vsub.f32 %v2219_v10, %v523_v36  ;;  %v617_v43 = vsel %vm420_vm0, %v583_v39, 0.0  ;;  %v623_v48 = vsel %vm420_vm0, %v585_v40, 0.0 }
  0xad   : > { %621 = vadd.xlane.f32.xlu0 %v620_v32  ;;  %618 = vadd.xlane.f32.xlu1 %v617_v43  ;;  %v441_v44 = vpop.xlane.xlu0 %440  ;;  %v444_v47 = vpop.xlane.xlu1 %443 }
  0xae   : > { %v524_v51 = vmul.f32 0.015625, %v441_v44  ;;  %v525_v52 = vmul.f32 0.015625, %v444_v47  ;;  %v586_v55 = vmul.f32 %v2378_v3, %v2378_v3  ;;  %v587_v9 = vmul.f32 %v2381_v6, %v2381_v6 }
  0xb0   : > { %v2390_v56 = vsub.f32 %v2226_v13, %v524_v51  ;;  %v2393_v10 = vsub.f32 %v2229_v14, %v525_v52  ;;  %v626_v59 = vsel %vm420_vm0, %v586_v55, 0.0  ;;  %v629_v0 = vsel %vm420_vm0, %v587_v9, 0.0 }
  0xb1   : > { %624 = vadd.xlane.f32.xlu1 %v623_v48  ;;  %627 = vadd.xlane.f32.xlu0 %v626_v59  ;;  %v447_v60 = vpop.xlane.xlu0 %446  ;;  %v450_v63 = vpop.xlane.xlu1 %449 }
  0xb2   : > { %v526_v4 = vmul.f32 0.015625, %v447_v60  ;;  %v527_v5 = vmul.f32 0.015625, %v450_v63  ;;  %v588_v7 = vmul.f32 %v2390_v56, %v2390_v56  ;;  %v589_v13 = vmul.f32 %v2393_v10, %v2393_v10 }
  0xb4   : > { %v2402_v8 = vsub.f32 %v2234_v16, %v526_v4  ;;  %v2405_v14 = vsub.f32 %v2239_v18, %v527_v5  ;;  %v632_v15 = vsel %vm420_vm0, %v588_v7, 0.0  ;;  %v635_v20 = vsel %vm420_vm0, %v589_v13, 0.0 }
  0xb5   : > { %630 = vadd.xlane.f32.xlu1 %v629_v0  ;;  %633 = vadd.xlane.f32.xlu0 %v632_v15  ;;  %v453_v17 = vpop.xlane.xlu0 %452  ;;  %v456_v19 = vpop.xlane.xlu1 %455 }
  0xb6   : > { %v528_v23 = vmul.f32 0.015625, %v453_v17  ;;  %v529_v24 = vmul.f32 0.015625, %v456_v19  ;;  %v590_v1 = vmul.f32 %v2402_v8, %v2402_v8  ;;  %v591_v16 = vmul.f32 %v2405_v14, %v2405_v14 }
  0xb8   : > { %v2414_v2 = vsub.f32 %v2246_v21, %v528_v23  ;;  %v2417_v18 = vsub.f32 %v2249_v22, %v529_v24  ;;  %v638_v31 = vsel %vm420_vm0, %v590_v1, 0.0  ;;  %v641_v36 = vsel %vm420_vm0, %v591_v16, 0.0  ;;  %v2034_v1 = vld [vmem:[%s3042_s4] sm:$0xff]  }
  0xb9   : > { %636 = vadd.xlane.f32.xlu1 %v635_v20  ;;  %639 = vadd.xlane.f32.xlu0 %v638_v31  ;;  %v459_v32 = vpop.xlane.xlu0 %458  ;;  %v462_v35 = vpop.xlane.xlu1 %461 }
  0xba   : > { %v530_v39 = vmul.f32 0.015625, %v459_v32  ;;  %v531_v40 = vmul.f32 0.015625, %v462_v35  ;;  %v592_v43 = vmul.f32 %v2414_v2, %v2414_v2  ;;  %v593_v21 = vmul.f32 %v2417_v18, %v2417_v18  ;;  %1965 = vmatprep.subr.bf16.mxu0 %v2034_v1 }
  0xbb   : > { %1966 = vmatpush3.bf16.msra.mxu0 %v2034_v1 }
  0xbc   : > { %v2426_v44 = vsub.f32 %v2256_v25, %v530_v39  ;;  %v2429_v22 = vsub.f32 %v2259_v26, %v531_v40  ;;  %v644_v47 = vsel %vm420_vm0, %v592_v43, 0.0  ;;  %v647_v52 = vsel %vm420_vm0, %v593_v21, 0.0  ;;  %v2035_v21 = vld [vmem:[%s3042_s4 + $0x8] sm:$0xff]  }
  0xbd   : > { %642 = vadd.xlane.f32.xlu1 %v641_v36  ;;  %645 = vadd.xlane.f32.xlu0 %v644_v47  ;;  %v465_v48 = vpop.xlane.xlu0 %464  ;;  %v468_v51 = vpop.xlane.xlu1 %467 }
  0xbe   : > { %v532_v55 = vmul.f32 0.015625, %v465_v48  ;;  %v533_v9 = vmul.f32 0.015625, %v468_v51  ;;  %v594_v59 = vmul.f32 %v2426_v44, %v2426_v44  ;;  %v595_v25 = vmul.f32 %v2429_v22, %v2429_v22  ;;  %1967 = vmatprep.subr.bf16.mxu0 %v2035_v21 }
  0xbf   : > { %1968 = vmatpush3.bf16.msra.mxu0 %v2035_v21 }
  0xc0   : > { %v2438_v60 = vsub.f32 %v2266_v29, %v532_v55  ;;  %v2441_v26 = vsub.f32 %v2269_v30, %v533_v9  ;;  %v650_v63 = vsel %vm420_vm0, %v594_v59, 0.0  ;;  %v653_v5 = vsel %vm420_vm0, %v595_v25, 0.0 }
  0xc1   : > { %648 = vadd.xlane.f32.xlu1 %v647_v52  ;;  %651 = vadd.xlane.f32.xlu0 %v650_v63  ;;  %v471_v0 = vpop.xlane.xlu0 %470  ;;  %v474_v4 = vpop.xlane.xlu1 %473  ;;  %v2036_v63 = vld [vmem:[%s3042_s4 + $0x10] sm:$0xff]  }
  0xc2   : > { %v534_v7 = vmul.f32 0.015625, %v471_v0  ;;  %v535_v13 = vmul.f32 0.015625, %v474_v4  ;;  %v596_v15 = vmul.f32 %v2438_v60, %v2438_v60  ;;  %v597_v29 = vmul.f32 %v2441_v26, %v2441_v26  ;;  %1969 = vmatprep.subr.bf16.mxu0 %v2036_v63 }
  0xc3   : > { %1970 = vmatpush3.bf16.msra.mxu0 %v2036_v63 }
  0xc4   : > { %v2450_v17 = vsub.f32 %v2276_v33, %v534_v7  ;;  %v2453_v30 = vsub.f32 %v2279_v34, %v535_v13  ;;  %v656_v19 = vsel %vm420_vm0, %v596_v15, 0.0  ;;  %v659_v24 = vsel %vm420_vm0, %v597_v29, 0.0 }
  0xc5   : > { %654 = vadd.xlane.f32.xlu1 %v653_v5  ;;  %657 = vadd.xlane.f32.xlu0 %v656_v19  ;;  %v477_v20 = vpop.xlane.xlu0 %476  ;;  %v480_v23 = vpop.xlane.xlu1 %479 }
  0xc6   : > { %v536_v16 = vmul.f32 0.015625, %v477_v20  ;;  %v537_v31 = vmul.f32 0.015625, %v480_v23  ;;  %v598_v33 = vmul.f32 %v2450_v17, %v2450_v17  ;;  %v599_v34 = vmul.f32 %v2453_v30, %v2453_v30  ;;  %v2037_v20 = vld [vmem:[%s3042_s4 + $0x18] sm:$0xff]  }
  0xc7   : > { %1971 = vmatprep.subr.bf16.mxu0 %v2037_v20 }
  0xc8   : > { %v2465_v32 = vsub.f32 %v2286_v37, %v536_v16  ;;  %v2468_v35 = vsub.f32 %v2289_v38, %v537_v31  ;;  %v662_v36 = vsel %vm420_vm0, %v598_v33, 0.0  ;;  %v665_v43 = vsel %vm420_vm0, %v599_v34, 0.0  ;;  %1972 = vmatpush3.bf16.msra.mxu0 %v2037_v20 }
  0xc9   : > { %660 = vadd.xlane.f32.xlu1 %v659_v24  ;;  %663 = vadd.xlane.f32.xlu0 %v662_v36  ;;  %v483_v39 = vpop.xlane.xlu0 %482  ;;  %v486_v40 = vpop.xlane.xlu1 %485 }
  0xca   : > { %v538_v47 = vmul.f32 0.015625, %v483_v39  ;;  %v539_v48 = vmul.f32 0.015625, %v486_v40  ;;  %v600_v37 = vmul.f32 %v2465_v32, %v2465_v32  ;;  %v601_v38 = vmul.f32 %v2468_v35, %v2468_v35 }
  0xcc   : > { %v2480_v51 = vsub.f32 %v2296_v41, %v538_v47  ;;  %v2483_v52 = vsub.f32 %v2299_v42, %v539_v48  ;;  %v668_v55 = vsel %vm420_vm0, %v600_v37, 0.0  ;;  %v671_v25 = vsel %vm420_vm0, %v601_v38, 0.0 }
  0xcd   : > { %666 = vadd.xlane.f32.xlu1 %v665_v43  ;;  %669 = vadd.xlane.f32.xlu0 %v668_v55  ;;  %v489_v9 = vpop.xlane.xlu0 %488  ;;  %v492_v59 = vpop.xlane.xlu1 %491 }
  0xce   : > { %v540_v0 = vmul.f32 0.015625, %v489_v9  ;;  %v541_v4 = vmul.f32 0.015625, %v492_v59  ;;  %v602_v41 = vmul.f32 %v2480_v51, %v2480_v51  ;;  %v603_v42 = vmul.f32 %v2483_v52, %v2483_v52 }
  0xd0   : > { %v2495_v5 = vsub.f32 %v2306_v45, %v540_v0  ;;  %v2498_v7 = vsub.f32 %v2309_v46, %v541_v4  ;;  %v674_v13 = vsel %vm420_vm0, %v602_v41, 0.0  ;;  %v677_v19 = vsel %vm420_vm0, %v603_v42, 0.0 }
  0xd1   : > { %672 = vadd.xlane.f32.xlu1 %v671_v25  ;;  %675 = vadd.xlane.f32.xlu0 %v674_v13  ;;  %v495_v15 = vpop.xlane.xlu0 %494  ;;  %v498_v29 = vpop.xlane.xlu1 %497 }
  0xd2   : > { %v542_v23 = vmul.f32 0.015625, %v495_v15  ;;  %v543_v24 = vmul.f32 0.015625, %v498_v29  ;;  %v604_v45 = vmul.f32 %v2495_v5, %v2495_v5  ;;  %v605_v46 = vmul.f32 %v2498_v7, %v2498_v7 }
  0xd4   : > { %v2510_v1 = vsub.f32 %v2316_v49, %v542_v23  ;;  %v2513_v16 = vsub.f32 %v2319_v50, %v543_v24  ;;  %v680_v31 = vsel %vm420_vm0, %v604_v45, 0.0  ;;  %v683_v36 = vsel %vm420_vm0, %v605_v46, 0.0 }
  0xd5   : > { %678 = vadd.xlane.f32.xlu1 %v677_v19  ;;  %681 = vadd.xlane.f32.xlu0 %v680_v31  ;;  %v501_v33 = vpop.xlane.xlu0 %500  ;;  %v504_v34 = vpop.xlane.xlu1 %503  ;;  %v2120_v46 = vmov 0   ;;  %v2571_v31 = vld [vmem:[%s3044_s6 + $0x8] sm:$0xff]  }
  0xd6   : > { %v544_v39 = vmul.f32 0.015625, %v501_v33  ;;  %v545_v40 = vmul.f32 0.015625, %v504_v34  ;;  %v606_v43 = vmul.f32 %v2510_v1, %v2510_v1  ;;  %v607_v49 = vmul.f32 %v2513_v16, %v2513_v16  ;;  %1444 = vmatprep.subr.bf16.mxu0 %v2120_v46  ;;  %2005 = vmatprep.subr.bf16.mxu1 %v2120_v46  ;;  %v2578_v33 = vld [vmem:[%s3044_s6 + $0x10] sm:$0xff]   ;;  %v2585_v34 = vld [vmem:[%s3044_s6 + $0x18] sm:$0xff]  }
  0xd8   : > { %v2522_v50 = vsub.f32 %v2326_v53, %v544_v39  ;;  %v2525_v21 = vsub.f32 %v2329_v54, %v545_v40  ;;  %v686_v47 = vsel %vm420_vm0, %v606_v43, 0.0  ;;  %v689_v38 = vsel %vm420_vm0, %v607_v49, 0.0  ;;  %v2599_v39 = vld [vmem:[%s3044_s6 + $0x28] sm:$0xff]   ;;  %v2606_v40 = vld [vmem:[%s3044_s6 + $0x30] sm:$0xff]   ;;  %v2613_v43 = vld [vmem:[%s3044_s6 + $0x38] sm:$0xff]  }
  0xd9   : > { %684 = vadd.xlane.f32.xlu1 %v683_v36  ;;  %687 = vadd.xlane.f32.xlu0 %v686_v47  ;;  %v507_v48 = vpop.xlane.xlu0 %506  ;;  %v510_v37 = vpop.xlane.xlu1 %509  ;;  %v2592_v36 = vld [vmem:[%s3044_s6 + $0x20] sm:$0xff]  }
  0xda   : > { %v546_v55 = vmul.f32 0.015625, %v507_v48  ;;  %v547_v9 = vmul.f32 0.015625, %v510_v37  ;;  %v608_v59 = vmul.f32 %v2522_v50, %v2522_v50  ;;  %v609_v53 = vmul.f32 %v2525_v21, %v2525_v21 }
  0xdc   : > { %v2534_v25 = vsub.f32 %v2336_v57, %v546_v55  ;;  %v2537_v54 = vsub.f32 %v2339_v58, %v547_v9  ;;  %v692_v63 = vsel %vm420_vm0, %v608_v59, 0.0  ;;  %v695_v41 = vsel %vm420_vm0, %v609_v53, 0.0 }
  0xdd   : > { %690 = vadd.xlane.f32.xlu1 %v689_v38  ;;  %693 = vadd.xlane.f32.xlu0 %v692_v63  ;;  %v513_v0 = vpop.xlane.xlu0 %512  ;;  %v516_v4 = vpop.xlane.xlu1 %515 }
  0xde   : > { %v548_v42 = vmul.f32 0.015625, %v513_v0  ;;  %v549_v13 = vmul.f32 0.015625, %v516_v4  ;;  %v610_v15 = vmul.f32 %v2534_v25, %v2534_v25  ;;  %v611_v57 = vmul.f32 %v2537_v54, %v2537_v54 }
  0xe0   : > { %v2546_v29 = vsub.f32 %v2346_v61, %v548_v42  ;;  %v2549_v58 = vsub.f32 %v2349_v62, %v549_v13  ;;  %v698_v19 = vsel %vm420_vm0, %v610_v15, 0.0  ;;  %v701_v20 = vsel %vm420_vm0, %v611_v57, 0.0  ;;  %v2562_v62 = vld [vmem:[%s3044_s6] sm:$0xff]  }
  0xe1   : > { %696 = vadd.xlane.f32.xlu1 %v695_v41  ;;  %699 = vadd.xlane.f32.xlu0 %v698_v19 }
  0xe2   : > { %v612_v23 = vmul.f32 %v2546_v29, %v2546_v29  ;;  %v613_v24 = vmul.f32 %v2549_v58, %v2549_v58  ;;  %2015 = vmatpush1.bf16.msra.mxu1 %v2562_v62 }
  0xe3   : > { %2006 = vmatprep.subr.bf16.mxu1 %v2120_v46 }
  0xe4   : > { %v704_v45 = vsel %vm420_vm0, %v612_v23, 0.0  ;;  %v707_v61 = vsel %vm420_vm0, %v613_v24, 0.0 }
  0xe5   : > { %702 = vadd.xlane.f32.xlu1 %v701_v20  ;;  %705 = vadd.xlane.f32.xlu0 %v704_v45 }
  0xe6   : > { %2016 = vmatpush1.bf16.msra.mxu1 %v2571_v31 }
  0xe7   : > { %2007 = vmatprep.subr.bf16.mxu1 %v2120_v46 }
  0xe9   : > { %708 = vadd.xlane.f32.xlu1 %v707_v61 }
  0xea   : > { %2017 = vmatpush1.bf16.msra.mxu1 %v2578_v33 }
  0xeb   : > { %2008 = vmatprep.subr.bf16.mxu1 %v2120_v46 }
  0xee   : > { %2018 = vmatpush1.bf16.msra.mxu1 %v2585_v34 }
  0xef   : > { %2009 = vmatprep.subr.bf16.mxu1 %v2120_v46 }
  0xf2   : > { %2019 = vmatpush1.bf16.msra.mxu1 %v2592_v36 }
  0xf3   : > { %2010 = vmatprep.subr.bf16.mxu1 %v2120_v46 }
  0xf6   : > { %2020 = vmatpush1.bf16.msra.mxu1 %v2599_v39 }
  0xf7   : > { %2011 = vmatprep.subr.bf16.mxu1 %v2120_v46 }
  0xfa   : > { %2021 = vmatpush1.bf16.msra.mxu1 %v2606_v40 }
  0xfb   : > { %2012 = vmatprep.subr.bf16.mxu1 %v2120_v46 }
  0xfe   : > { %2022 = vmatpush1.bf16.msra.mxu1 %v2613_v43 }
  0xff   : > { %2013 = vmatprep.subr.bf16.mxu1 %v2120_v46 }
 0x136   : > { %v616_v49 = vpop.xlane.xlu0 %615 }
 0x137   : > { %v710_v47 = vmul.f32 0.015625, %v616_v49 }
 0x139   : > { %v742_v48 = vadd.f32 1e-05, %v710_v47 }
 0x13a   : > { %v619_v37 = vpop.xlane.xlu1 %618  ;;  %v622_v38 = vpop.xlane.xlu0 %621 }
 0x13b   : > { %2048 = vrsqrt.f32 %v742_v48  ;;  %v711_v55 = vmul.f32 0.015625, %v619_v37  ;;  %v712_v9 = vmul.f32 0.015625, %v622_v38  ;;  %v2621_v38 = vld [vmem:[%s3040_s2] ss:$0 sm:$0xff] }
 0x13d   : > { %v743_v59 = vadd.f32 1e-05, %v711_v55  ;;  %v744_v53 = vadd.f32 1e-05, %v712_v9 }
 0x13e   : > { %v625_v63 = vpop.xlane.xlu1 %624  ;;  %v628_v0 = vpop.xlane.xlu0 %627 }
 0x13f   : > { %2050 = vrsqrt.f32 %v743_v59  ;;  %v713_v4 = vmul.f32 0.015625, %v625_v63  ;;  %v714_v41 = vmul.f32 0.015625, %v628_v0 }
 0x140   : > { %2052 = vrsqrt.f32 %v744_v53 }
 0x141   : > { %v745_v42 = vadd.f32 1e-05, %v713_v4  ;;  %v746_v13 = vadd.f32 1e-05, %v714_v41 }
 0x142   : > { %v631_v15 = vpop.xlane.xlu1 %630  ;;  %v634_v57 = vpop.xlane.xlu0 %633 }
 0x143   : > { %2054 = vrsqrt.f32 %v745_v42  ;;  %v715_v19 = vmul.f32 0.015625, %v631_v15  ;;  %v716_v20 = vmul.f32 0.015625, %v634_v57  ;;  %v2629_v15 = vld [vmem:[%s3041_s3] ss:$0 sm:$0xff] }
 0x144   : > { %2056 = vrsqrt.f32 %v746_v13 }
 0x145   : > { %v2049_v23 = vpop.eup %2048  ;;  %v747_v24 = vadd.f32 1e-05, %v715_v19  ;;  %v748_v45 = vadd.f32 1e-05, %v716_v20 }
 0x146   : > { %v637_v61 = vpop.xlane.xlu1 %636  ;;  %v640_v49 = vpop.xlane.xlu0 %639  ;;  %v806_v47 = vmul.f32 %v2049_v23, %v2356_v11 }
 0x147   : > { %2058 = vrsqrt.f32 %v747_v24  ;;  %v717_v48 = vmul.f32 0.015625, %v637_v61  ;;  %v718_v37 = vmul.f32 0.015625, %v640_v49 }
 0x148   : > { %2060 = vrsqrt.f32 %v748_v45  ;;  %v845_v41 = vmul.f32 %v2621_v38, %v806_v47 }
 0x149   : > { %v2051_v55 = vpop.eup %2050  ;;  %v749_v9 = vadd.f32 1e-05, %v717_v48  ;;  %v750_v59 = vadd.f32 1e-05, %v718_v37 }
 0x14a   : > { %v2053_v53 = vpop.eup %2052  ;;  %v643_v63 = vpop.xlane.xlu1 %642  ;;  %v807_v4 = vmul.f32 %v2051_v55, %v2366_v27 }
 0x14b   : > { %v646_v0 = vpop.xlane.xlu0 %645  ;;  %v808_v11 = vmul.f32 %v2053_v53, %v2359_v12  ;;  %2062 = vrsqrt.f32 %v749_v9  ;;  %v719_v42 = vmul.f32 0.015625, %v643_v63  ;;  %v884_v12 = vadd.f32 %v2629_v15, %v845_v41 }
 0x14c   : > { %v720_v13 = vmul.f32 0.015625, %v646_v0  ;;  %2064 = vrsqrt.f32 %v750_v59  ;;  %v846_v57 = vmul.f32 %v2621_v38, %v807_v4 }
 0x14d   : > { %v2055_v19 = vpop.eup %2054  ;;  %v751_v20 = vadd.f32 1e-05, %v719_v42  ;;  %v847_v47 = vmul.f32 %v2621_v38, %v808_v11 }
 0x14e   : > { %v752_v23 = vadd.f32 1e-05, %v720_v13  ;;  %v2057_v24 = vpop.eup %2056  ;;  %v809_v27 = vmul.f32 %v2055_v19, %v2369_v28  ;;  %v649_v45 = vpop.xlane.xlu1 %648  ;;  %v885_v49 = vadd.f32 %v2629_v15, %v846_v57 }
 0x14f   : > { %v652_v61 = vpop.xlane.xlu0 %651  ;;  %v810_v48 = vmul.f32 %v2057_v24, %v2378_v3  ;;  %2066 = vrsqrt.f32 %v751_v20  ;;  %v721_v37 = vmul.f32 0.015625, %v649_v45  ;;  %v886_v11 = vadd.f32 %v2629_v15, %v847_v47 }
 0x150   : > { %v722_v55 = vmul.f32 0.015625, %v652_v61  ;;  %2068 = vrsqrt.f32 %v752_v23  ;;  %v916_v9 = vpack.c.bf16 %v885_v49, %v884_v12  ;;  %v848_v59 = vmul.f32 %v2621_v38, %v809_v27 }
 0x151   : > { %v2059_v53 = vpop.eup %2058  ;;  %v753_v63 = vadd.f32 1e-05, %v721_v37  ;;  %v849_v13 = vmul.f32 %v2621_v38, %v810_v48 }
 0x152   : > { %v754_v28 = vadd.f32 1e-05, %v722_v55  ;;  %v2061_v0 = vpop.eup %2060  ;;  %v811_v4 = vmul.f32 %v2059_v53, %v2381_v6  ;;  %v655_v41 = vpop.xlane.xlu1 %654  ;;  %1973 = vmatprep.mubr.msk.bf16.mxu0 %vm420_vm0, %v916_v9  ;;  %v887_v3 = vadd.f32 %v2629_v15, %v848_v59 }
 0x153   : > { %v658_v42 = vpop.xlane.xlu0 %657  ;;  %v812_v57 = vmul.f32 %v2061_v0, %v2390_v56  ;;  %2070 = vrsqrt.f32 %v753_v63  ;;  %v723_v19 = vmul.f32 0.015625, %v655_v41  ;;  %v888_v48 = vadd.f32 %v2629_v15, %v849_v13 }
 0x154   : > { %v724_v20 = vmul.f32 0.015625, %v658_v42  ;;  %2072 = vrsqrt.f32 %v754_v28  ;;  %v917_v23 = vpack.c.bf16 %v887_v3, %v886_v11  ;;  %v850_v24 = vmul.f32 %v2621_v38, %v811_v4 }
 0x155   : > { %v2063_v6 = vpop.eup %2062  ;;  %v755_v27 = vadd.f32 1e-05, %v723_v19  ;;  %v851_v37 = vmul.f32 %v2621_v38, %v812_v57 }
 0x156   : > { %v756_v45 = vadd.f32 1e-05, %v724_v20  ;;  %v2065_v61 = vpop.eup %2064  ;;  %v813_v12 = vmul.f32 %v2063_v6, %v2393_v10  ;;  %v661_v49 = vpop.xlane.xlu1 %660  ;;  %1974 = vmatmul.mubr.msk.bf16.vlgmr.msra.gmra.mrb[0].mxu0 %vm420_vm0, %v917_v23  ;;  %v889_v56 = vadd.f32 %v2629_v15, %v850_v24 }
 0x157   : > { %v664_v47 = vpop.xlane.xlu0 %663  ;;  %v814_v55 = vmul.f32 %v2065_v61, %v2402_v8  ;;  %2074 = vrsqrt.f32 %v755_v27  ;;  %v725_v9 = vmul.f32 0.015625, %v661_v49  ;;  %1445 = vmatpush1.bf16.msra.mxu0 %v2562_v62  ;;  %v890_v11 = vadd.f32 %v2629_v15, %v851_v37 }
 0x158   : > { %v726_v59 = vmul.f32 0.015625, %v664_v47  ;;  %2076 = vrsqrt.f32 %v756_v45  ;;  %v918_v53 = vpack.c.bf16 %v889_v56, %v888_v48  ;;  %v852_v10 = vmul.f32 %v2621_v38, %v813_v12  ;;  %1446 = vmatprep.subr.bf16.mxu0 %v2120_v46 }
 0x159   : > { %v2067_v63 = vpop.eup %2066  ;;  %v757_v28 = vadd.f32 1e-05, %v725_v9  ;;  %v853_v3 = vmul.f32 %v2621_v38, %v814_v55 }
 0x15a   : > { %v758_v0 = vadd.f32 1e-05, %v726_v59  ;;  %v2069_v4 = vpop.eup %2068  ;;  %v815_v41 = vmul.f32 %v2067_v63, %v2405_v14  ;;  %v667_v42 = vpop.xlane.xlu1 %666  ;;  %1977 = vmatprep.mubr.msk.bf16.mxu0 %vm420_vm0, %v918_v53  ;;  %v891_v62 = vadd.f32 %v2629_v15, %v852_v10 }
 0x15b   : > { %v670_v8 = vpop.xlane.xlu0 %669  ;;  %v816_v13 = vmul.f32 %v2069_v4, %v2414_v2  ;;  %2078 = vrsqrt.f32 %v757_v28  ;;  %v727_v57 = vmul.f32 0.015625, %v667_v42  ;;  %1447 = vmatpush1.bf16.msra.mxu0 %v2571_v31  ;;  %v892_v12 = vadd.f32 %v2629_v15, %v853_v3 }
 0x15c   : > { %v728_v19 = vmul.f32 0.015625, %v670_v8  ;;  %2080 = vrsqrt.f32 %v758_v0  ;;  %v919_v20 = vpack.c.bf16 %v891_v62, %v890_v11  ;;  %v854_v14 = vmul.f32 %v2621_v38, %v815_v41  ;;  %1448 = vmatprep.subr.bf16.mxu0 %v2120_v46 }
 0x15d   : > { %v2071_v23 = vpop.eup %2070  ;;  %v759_v24 = vadd.f32 1e-05, %v727_v57  ;;  %v855_v49 = vmul.f32 %v2621_v38, %v816_v13 }
 0x15e   : > { %v760_v6 = vadd.f32 1e-05, %v728_v19  ;;  %v2073_v27 = vpop.eup %2072  ;;  %v817_v45 = vmul.f32 %v2071_v23, %v2417_v18  ;;  %v673_v61 = vpop.xlane.xlu1 %672  ;;  %1978 = vmatmul.mubr.msk.bf16.gmra.mrb[4].mxu0 %vm420_vm0, %v919_v20  ;;  %v893_v31 = vadd.f32 %v2629_v15, %v854_v14 }
 0x15f   : > { %v676_v2 = vpop.xlane.xlu0 %675  ;;  %v818_v47 = vmul.f32 %v2073_v27, %v2426_v44  ;;  %2082 = vrsqrt.f32 %v759_v24  ;;  %v729_v48 = vmul.f32 0.015625, %v673_v61  ;;  %1449 = vmatpush1.bf16.msra.mxu0 %v2578_v33  ;;  %v894_v28 = vadd.f32 %v2629_v15, %v855_v49 }
 0x160   : > { %v730_v56 = vmul.f32 0.015625, %v676_v2  ;;  %2084 = vrsqrt.f32 %v760_v6  ;;  %v920_v37 = vpack.c.bf16 %v893_v31, %v892_v12  ;;  %v856_v18 = vmul.f32 %v2621_v38, %v817_v45  ;;  %1450 = vmatprep.subr.bf16.mxu0 %v2120_v46 }
 0x161   : > { %v2075_v55 = vpop.eup %2074  ;;  %v761_v9 = vadd.f32 1e-05, %v729_v48  ;;  %v857_v0 = vmul.f32 %v2621_v38, %v818_v47 }
 0x162   : > { %v762_v59 = vadd.f32 1e-05, %v730_v56  ;;  %v2077_v53 = vpop.eup %2076  ;;  %v819_v10 = vmul.f32 %v2075_v55, %v2429_v22  ;;  %v679_v63 = vpop.xlane.xlu1 %678  ;;  %1981 = vmatprep.mubr.msk.bf16.mxu0 %vm420_vm0, %v920_v37  ;;  %v895_v33 = vadd.f32 %v2629_v15, %v856_v18 }
 0x163   : > { %v682_v44 = vpop.xlane.xlu0 %681  ;;  %v820_v4 = vmul.f32 %v2077_v53, %v2438_v60  ;;  %2086 = vrsqrt.f32 %v761_v9  ;;  %v731_v41 = vmul.f32 0.015625, %v679_v63  ;;  %1451 = vmatpush1.bf16.msra.mxu0 %v2585_v34  ;;  %v896_v20 = vadd.f32 %v2629_v15, %v857_v0 }
 0x164   : > { %v732_v42 = vmul.f32 0.015625, %v682_v44  ;;  %2088 = vrsqrt.f32 %v762_v59  ;;  %v921_v8 = vpack.c.bf16 %v895_v33, %v894_v28  ;;  %v858_v22 = vmul.f32 %v2621_v38, %v819_v10  ;;  %1452 = vmatprep.subr.bf16.mxu0 %v2120_v46 }
 0x165   : > { %v2079_v11 = vpop.eup %2078  ;;  %v763_v62 = vadd.f32 1e-05, %v731_v41  ;;  %v859_v14 = vmul.f32 %v2621_v38, %v820_v4 }
 0x166   : > { %v764_v3 = vadd.f32 1e-05, %v732_v42  ;;  %v2081_v13 = vpop.eup %2080  ;;  %v821_v57 = vmul.f32 %v2079_v11, %v2441_v26  ;;  %v685_v19 = vpop.xlane.xlu1 %684  ;;  %1982 = vmatmul.mubr.msk.bf16.gmra.mrb[8].mxu0 %vm420_vm0, %v921_v8  ;;  %v897_v34 = vadd.f32 %v2629_v15, %v858_v22 }
 0x167   : > { %v688_v60 = vpop.xlane.xlu0 %687  ;;  %v822_v23 = vmul.f32 %v2081_v13, %v2450_v17  ;;  %2090 = vrsqrt.f32 %v763_v62  ;;  %v733_v24 = vmul.f32 0.015625, %v685_v19  ;;  %1453 = vmatpush1.bf16.msra.mxu0 %v2592_v36  ;;  %v898_v47 = vadd.f32 %v2629_v15, %v859_v14 }
 0x168   : > { %v734_v6 = vmul.f32 0.015625, %v688_v60  ;;  %2092 = vrsqrt.f32 %v764_v3  ;;  %v922_v27 = vpack.c.bf16 %v897_v34, %v896_v20  ;;  %v860_v26 = vmul.f32 %v2621_v38, %v821_v57  ;;  %1454 = vmatprep.subr.bf16.mxu0 %v2120_v46 }
 0x169   : > { %v2083_v45 = vpop.eup %2082  ;;  %v765_v61 = vadd.f32 1e-05, %v733_v24  ;;  %v861_v48 = vmul.f32 %v2621_v38, %v822_v23 }
 0x16a   : > { %v766_v2 = vadd.f32 1e-05, %v734_v6  ;;  %v2085_v12 = vpop.eup %2084  ;;  %v823_v31 = vmul.f32 %v2083_v45, %v2453_v30  ;;  %v691_v49 = vpop.xlane.xlu1 %690  ;;  %1985 = vmatprep.mubr.msk.bf16.mxu0 %vm420_vm0, %v922_v27  ;;  %v899_v36 = vadd.f32 %v2629_v15, %v860_v26 }
 0x16b   : > { %v694_v17 = vpop.xlane.xlu0 %693  ;;  %v824_v56 = vmul.f32 %v2085_v12, %v2465_v32  ;;  %2094 = vrsqrt.f32 %v765_v61  ;;  %v735_v37 = vmul.f32 0.015625, %v691_v49  ;;  %1455 = vmatpush1.bf16.msra.mxu0 %v2599_v39  ;;  %v900_v28 = vadd.f32 %v2629_v15, %v861_v48 }
 0x16c   : > { %v736_v18 = vmul.f32 0.015625, %v694_v17  ;;  %2096 = vrsqrt.f32 %v766_v2  ;;  %v923_v55 = vpack.c.bf16 %v899_v36, %v898_v47  ;;  %v862_v30 = vmul.f32 %v2621_v38, %v823_v31  ;;  %1456 = vmatprep.subr.bf16.mxu0 %v2120_v46 }
 0x16d   : > { %v2087_v9 = vpop.eup %2086  ;;  %v767_v59 = vadd.f32 1e-05, %v735_v37  ;;  %v863_v33 = vmul.f32 %v2621_v38, %v824_v56 }
 0x16e   : > { %v768_v53 = vadd.f32 1e-05, %v736_v18  ;;  %v2089_v10 = vpop.eup %2088  ;;  %v825_v63 = vmul.f32 %v2087_v9, %v2468_v35  ;;  %v697_v44 = vpop.xlane.xlu1 %696  ;;  %1986 = vmatmul.mubr.msk.bf16.gmra.mrb[12].mxu0 %vm420_vm0, %v923_v55  ;;  %v901_v39 = vadd.f32 %v2629_v15, %v862_v30 }
 0x16f   : > { %v700_v32 = vpop.xlane.xlu0 %699  ;;  %v826_v0 = vmul.f32 %v2089_v10, %v2480_v51  ;;  %2098 = vrsqrt.f32 %v767_v59  ;;  %v737_v4 = vmul.f32 0.015625, %v697_v44  ;;  %1457 = vmatpush1.bf16.msra.mxu0 %v2606_v40  ;;  %v902_v57 = vadd.f32 %v2629_v15, %v863_v33 }
 0x170   : > { %v738_v41 = vmul.f32 0.015625, %v700_v32  ;;  %2100 = vrsqrt.f32 %v768_v53  ;;  %v924_v42 = vpack.c.bf16 %v901_v39, %v900_v28  ;;  %v864_v35 = vmul.f32 %v2621_v38, %v825_v63  ;;  %1458 = vmatprep.subr.bf16.mxu0 %v2120_v46 }
 0x171   : > { %v2091_v8 = vpop.eup %2090  ;;  %v769_v22 = vadd.f32 1e-05, %v737_v4  ;;  %v865_v19 = vmul.f32 %v2621_v38, %v826_v0 }
 0x172   : > { %v770_v11 = vadd.f32 1e-05, %v738_v41  ;;  %v2093_v62 = vpop.eup %2092  ;;  %v827_v3 = vmul.f32 %v2091_v8, %v2483_v52  ;;  %v703_v13 = vpop.xlane.xlu1 %702  ;;  %1989 = vmatprep.mubr.msk.bf16.mxu0 %vm420_vm0, %v924_v42  ;;  %v903_v40 = vadd.f32 %v2629_v15, %v864_v35 }
 0x173   : > { %v706_v51 = vpop.xlane.xlu0 %705  ;;  %v828_v60 = vmul.f32 %v2093_v62, %v2495_v5  ;;  %2102 = vrsqrt.f32 %v769_v22  ;;  %v739_v20 = vmul.f32 0.015625, %v703_v13  ;;  %1459 = vmatpush1.bf16.msra.mxu0 %v2613_v43  ;;  %v904_v5 = vadd.f32 %v2629_v15, %v865_v19 }
 0x174   : > { %v740_v34 = vmul.f32 0.015625, %v706_v51  ;;  %2104 = vrsqrt.f32 %v770_v11  ;;  %v925_v14 = vpack.c.bf16 %v903_v40, %v902_v57  ;;  %v866_v52 = vmul.f32 %v2621_v38, %v827_v3  ;;  %1460 = vmatprep.subr.bf16.mxu0 %v2120_v46  ;;  %v2047_v51 = vld [vmem:[%s3044_s6 + $0x48] sm:$0xff]  }
 0x175   : > { %v2095_v23 = vpop.eup %2094  ;;  %v771_v24 = vadd.f32 1e-05, %v739_v20  ;;  %v867_v43 = vmul.f32 %v2621_v38, %v828_v60  ;;  %v1222_v60 = vld [vmem:[%s2759_s12 + $0x50] sm:$0xff]  ;;  %v1223_v20 = vld [vmem:[%s2759_s12 + $0x58] sm:$0xff] }
 0x176   : > { %v772_v6 = vadd.f32 1e-05, %v740_v34  ;;  %v2097_v27 = vpop.eup %2096  ;;  %v829_v26 = vmul.f32 %v2095_v23, %v2498_v7  ;;  %v709_v45 = vpop.xlane.xlu1 %708  ;;  %1990 = vmatmul.mubr.msk.bf16.gmra.mrb[16].mxu0 %vm420_vm0, %v925_v14  ;;  %v905_v61 = vadd.f32 %v2629_v15, %v866_v52  ;;  %v1254_v34 = vmax.f32 %v1222_v60, 0.0 }
 0x177   : > { %v830_v2 = vmul.f32 %v2097_v27, %v2510_v1  ;;  %2106 = vrsqrt.f32 %v771_v24  ;;  %v741_v12 = vmul.f32 0.015625, %v709_v45  ;;  %v906_v48 = vadd.f32 %v2629_v15, %v867_v43  ;;  %v1214_v24 = vld [vmem:[%s2759_s12 + $0x10] sm:$0xff] }
 0x178   : > { %2108 = vrsqrt.f32 %v772_v6  ;;  %v926_v31 = vpack.c.bf16 %v905_v61, %v904_v5  ;;  %v868_v49 = vmul.f32 %v2621_v38, %v829_v26  ;;  %v1255_v14 = vmax.f32 %v1223_v20, 0.0  ;;  %v1215_v6 = vld [vmem:[%s2759_s12 + $0x18] sm:$0xff] }
 0x179   : > { %v2099_v17 = vpop.eup %2098  ;;  %v773_v47 = vadd.f32 1e-05, %v741_v12  ;;  %v869_v37 = vmul.f32 %v2621_v38, %v830_v2  ;;  %v1246_v2 = vmax.f32 %v1214_v24, 0.0  ;;  %v1247_v12 = vmax.f32 %v1215_v6, 0.0  ;;  %v1221_v24 = vld [vmem:[%s2759_s12 + $0x48] sm:$0xff]  ;;  %v1226_v6 = vld [vmem:[%s2759_s12 + $0x70] sm:$0xff] }
 0x17a   : > { %v2101_v7 = vpop.eup %2100  ;;  %v831_v36 = vmul.f32 %v2099_v17, %v2513_v16  ;;  %1993 = vmatprep.mubr.msk.bf16.mxu0 %vm420_vm0, %v926_v31  ;;  %v907_v56 = vadd.f32 %v2629_v15, %v868_v49  ;;  %v1287_v52 = vpack.c.bf16 %v1255_v14, %v1254_v34  ;;  %v1220_v14 = vld [vmem:[%s2759_s12 + $0x40] sm:$0xff] }
 0x17b   : > { %v832_v1 = vmul.f32 %v2101_v7, %v2522_v50  ;;  %2110 = vrsqrt.f32 %v773_v47  ;;  %v908_v16 = vadd.f32 %v2629_v15, %v869_v37 }
 0x17c   : > { %v927_v18 = vpack.c.bf16 %v907_v56, %v906_v48  ;;  %v870_v55 = vmul.f32 %v2621_v38, %v831_v36  ;;  %1930 = vmatprep.mubr.msk.bf16.mxu1 %vm1395_vm1, %v1287_v52  ;;  %v1279_v48 = vpack.c.bf16 %v1247_v12, %v1246_v2 }
 0x17d   : > { %v2103_v30 = vpop.eup %2102  ;;  %v871_v10 = vmul.f32 %v2621_v38, %v832_v1  ;;  %v1216_v1 = vld [vmem:[%s2759_s12 + $0x20] sm:$0xff] }
 0x17e   : > { %v2105_v9 = vpop.eup %2104  ;;  %v833_v59 = vmul.f32 %v2103_v30, %v2525_v21  ;;  %1994 = vmatmul.mubr.msk.bf16.gmra.mrb[20].mxu0 %vm420_vm0, %v927_v18  ;;  %v909_v53 = vadd.f32 %v2629_v15, %v870_v55  ;;  %v1217_v18 = vld [vmem:[%s2759_s12 + $0x28] sm:$0xff] }
 0x17f   : > { %v834_v63 = vmul.f32 %v2105_v9, %v2534_v25  ;;  %v910_v21 = vadd.f32 %v2629_v15, %v871_v10  ;;  %v1248_v10 = vmax.f32 %v1216_v1, 0.0 }
 0x180   : > { %v928_v44 = vpack.c.bf16 %v909_v53, %v908_v16  ;;  %v872_v50 = vmul.f32 %v2621_v38, %v833_v59 }
 0x181   : > { %v2107_v32 = vpop.eup %2106  ;;  %v873_v0 = vmul.f32 %v2621_v38, %v834_v63  ;;  %v1249_v63 = vmax.f32 %v1217_v18, 0.0 }
 0x182   : > { %v2109_v28 = vpop.eup %2108  ;;  %v835_v39 = vmul.f32 %v2107_v32, %v2537_v54  ;;  %1997 = vmatprep.mubr.msk.bf16.mxu0 %vm420_vm0, %v928_v44  ;;  %v911_v33 = vadd.f32 %v2629_v15, %v872_v50 }
 0x183   : > { %v836_v4 = vmul.f32 %v2109_v28, %v2546_v29  ;;  %v912_v54 = vadd.f32 %v2629_v15, %v873_v0  ;;  %v1224_v0 = vld [vmem:[%s2759_s12 + $0x60] sm:$0xff] }
 0x184   : > { %v929_v41 = vpack.c.bf16 %v911_v33, %v910_v21  ;;  %v874_v25 = vmul.f32 %v2621_v38, %v835_v39  ;;  %v1281_v33 = vpack.c.bf16 %v1249_v63, %v1248_v10 }
 0x185   : > { %v2111_v42 = vpop.eup %2110  ;;  %v875_v22 = vmul.f32 %v2621_v38, %v836_v4  ;;  %v1225_v4 = vld [vmem:[%s2759_s12 + $0x68] sm:$0xff] }
 0x186   : > { %v837_v35 = vmul.f32 %v2111_v42, %v2549_v58  ;;  %1998 = vmatmul.mubr.msk.bf16.gmra.mrb[24].mxu0 %vm420_vm0, %v929_v41  ;;  %v913_v8 = vadd.f32 %v2629_v15, %v874_v25  ;;  %v2046_v58 = vld [vmem:[%s3044_s6 + $0x40] sm:$0xff]   ;;  %v1218_v42 = vld [vmem:[%s2759_s12 + $0x30] sm:$0xff] }
 0x187   : > { %v914_v29 = vadd.f32 %v2629_v15, %v875_v22  ;;  %1461 = vmatpush1.bf16.msra.mxu0 %v2046_v58  ;;  %2023 = vmatpush1.bf16.msra.mxu1 %v2046_v58  ;;  %v1250_v58 = vmax.f32 %v1218_v42, 0.0 }
 0x188   : > { %v930_v11 = vpack.c.bf16 %v913_v8, %v912_v54  ;;  %v876_v62 = vmul.f32 %v2621_v38, %v837_v35  ;;  %1462 = vmatprep.subr.bf16.mxu0 %v2120_v46  ;;  %v1212_v38 = vld [vmem:[%s2759_s12] sm:$0xff]  ;;  %2014 = vmatprep.subr.bf16.mxu1 %v2120_v46  ;;  %v1219_v35 = vld [vmem:[%s2759_s12 + $0x38] sm:$0xff] }
 0x189   : > { %v1244_v57 = vmax.f32 %v1212_v38, 0.0  ;;  %v2778_v46 = vld [vmem:[%s3043_s5] ss:$0 sm:$0xff]  ;;  %v1251_v38 = vmax.f32 %v1219_v35, 0.0 }
 0x18a   : > { %2001 = vmatprep.mubr.msk.bf16.mxu0 %vm420_vm0, %v930_v11  ;;  %v915_v3 = vadd.f32 %v2629_v15, %v876_v62  ;;  %v1213_v15 = vld [vmem:[%s2759_s12 + $0x8] sm:$0xff]  ;;  %v1256_v62 = vmax.f32 %v1224_v0, 0.0 }
 0x18b   : > { %v1245_v40 = vmax.f32 %v1213_v15, 0.0  ;;  %1463 = vmatpush1.bf16.msra.mxu0 %v2047_v51  ;;  %2024 = vmatpush1.bf16.msra.mxu1 %v2047_v51  ;;  %v1283_v34 = vpack.c.bf16 %v1251_v38, %v1250_v58 }
 0x18c   : > { %v931_v13 = vpack.c.bf16 %v915_v3, %v914_v29  ;;  %v1257_v29 = vmax.f32 %v1225_v4, 0.0 }
 0x18d   : > { %v1277_v19 = vpack.c.bf16 %v1245_v40, %v1244_v57 }
 0x18e   : > { %2002 = vmatmul.mubr.msk.bf16.gmra.mrb[28].mxu0 %vm420_vm0, %v931_v13  ;;  %v1289_v60 = vpack.c.bf16 %v1257_v29, %v1256_v62 }
 0x18f   : > { %1925 = vmatprep.mubr.msk.bf16.mxu0 %vm1395_vm1, %v1277_v19 }
 0x229   : > { %v1975_v23 = vpop.f32.mrb[0].mxu0 }
 0x22a   : > { %v1062_v27 = vadd.f32 %v1975_v23, %v2778_v46  ;;  %v1053_v26 = vpop.f32.mrb[1].mxu0 }
 0x22b   : > { %v1054_v45 = vadd.f32 %v2778_v46, %v1053_v26  ;;  %v1976_v5 = vpop.f32.mrb[2].mxu0 }
 0x22c   : > { %v1065_v61 = vadd.f32 %v1976_v5, %v2778_v46  ;;  %v1056_v43 = vpop.f32.mrb[3].mxu0  ;;  %v1182_v49 = vmax.f32 %v1062_v27, 0.0  ;;  %v1227_v27 = vld [vmem:[%s2759_s12 + $0x78] sm:$0xff] }
 0x22d   : > { %v1057_v31 = vadd.f32 %v2778_v46, %v1056_v43  ;;  %v1180_v47 = vmax.f32 %v1054_v45, 0.0  ;;  %v1252_v43 = vmax.f32 %v1220_v14, 0.0 }
 0x22e   : > { %v1183_v17 = vmax.f32 %v1065_v61, 0.0 }
 0x22f   : > { %v1181_v7 = vmax.f32 %v1057_v31, 0.0  ;;  %v1253_v31 = vmax.f32 %v1221_v24, 0.0 }
 0x230   : > { %v1278_v36 = vpack.c.bf16 %v1183_v17, %v1182_v49  ;;  %v1258_v49 = vmax.f32 %v1226_v6, 0.0  ;;  %v1259_v17 = vmax.f32 %v1227_v27, 0.0 }
 0x231   : > { %v1276_v56 = vpack.c.bf16 %v1181_v7, %v1180_v47  ;;  %v1979_v37 = vpop.f32.mrb[4].mxu0  ;;  %v1285_v1 = vpack.c.bf16 %v1253_v31, %v1252_v43 }
 0x232   : > { %v1078_v55 = vadd.f32 %v1979_v37, %v2778_v46  ;;  %v1069_v30 = vpop.f32.mrb[5].mxu0  ;;  %v1291_v18 = vpack.c.bf16 %v1259_v17, %v1258_v49 }
 0x233   : > { %v1070_v9 = vadd.f32 %v2778_v46, %v1069_v30  ;;  %v1980_v59 = vpop.f32.mrb[6].mxu0  ;;  %1477 = vmatmul.mubr.bf16.vlgmr.msra.gmra.mrb[32].mxu0 %v1276_v56 }
 0x234   : > { %v1081_v16 = vadd.f32 %v1980_v59, %v2778_v46  ;;  %v1072_v53 = vpop.f32.mrb[7].mxu0  ;;  %1926 = vmatprep.mubr.msk.bf16.mxu0 %vm1395_vm1, %v1279_v48  ;;  %v1186_v50 = vmax.f32 %v1078_v55, 0.0  ;;  %v1229_v59 = vld [vmem:[%s2759_s12 + $0x88] sm:$0xff] }
 0x235   : > { %v1073_v44 = vadd.f32 %v2778_v46, %v1072_v53  ;;  %v1184_v28 = vmax.f32 %v1070_v9, 0.0  ;;  %v1228_v9 = vld [vmem:[%s2759_s12 + $0x80] sm:$0xff] }
 0x236   : > { %v1187_v32 = vmax.f32 %v1081_v16, 0.0 }
 0x237   : > { %v1185_v39 = vmax.f32 %v1073_v44, 0.0 }
 0x238   : > { %v2793_v21 = vpack.c.bf16 %v1187_v32, %v1186_v50  ;;  %v1260_v32 = vmax.f32 %v1228_v9, 0.0 }
 0x239   : > { %v1280_v41 = vpack.c.bf16 %v1185_v39, %v1184_v28  ;;  %v1983_v25 = vpop.f32.mrb[8].mxu0  ;;  %v1261_v28 = vmax.f32 %v1229_v59, 0.0 }
 0x23a   : > { %v1094_v54 = vadd.f32 %v1983_v25, %v2778_v46  ;;  %v1085_v8 = vpop.f32.mrb[9].mxu0 }
 0x23b   : > { %v1086_v22 = vadd.f32 %v2778_v46, %v1085_v8  ;;  %v1984_v11 = vpop.f32.mrb[10].mxu0  ;;  %1485 = vmatmul.mubr.bf16.gmra.mrb[36].mxu0 %v1278_v36  ;;  %v1231_v8 = vld [vmem:[%s2759_s12 + $0x98] sm:$0xff] }
 0x23c   : > { %v1097_v3 = vadd.f32 %v1984_v11, %v2778_v46  ;;  %v1088_v13 = vpop.f32.mrb[11].mxu0  ;;  %1927 = vmatprep.mubr.msk.bf16.mxu0 %vm1395_vm1, %v1281_v33  ;;  %v1190_v51 = vmax.f32 %v1094_v54, 0.0  ;;  %v1230_v54 = vld [vmem:[%s2759_s12 + $0x90] sm:$0xff]  ;;  %v1263_v38 = vmax.f32 %v1231_v8, 0.0 }
 0x23d   : > { %v1089_v15 = vadd.f32 %v2778_v46, %v1088_v13  ;;  %v1188_v40 = vmax.f32 %v1086_v22, 0.0  ;;  %v1262_v58 = vmax.f32 %v1230_v54, 0.0 }
 0x23e   : > { %v1191_v57 = vmax.f32 %v1097_v3, 0.0 }
 0x23f   : > { %v1189_v19 = vmax.f32 %v1089_v15, 0.0 }
 0x240   : > { %v1286_v20 = vpack.c.bf16 %v1191_v57, %v1190_v51 }
 0x241   : > { %v1284_v52 = vpack.c.bf16 %v1189_v19, %v1188_v40  ;;  %v1987_v23 = vpop.f32.mrb[12].mxu0 }
 0x242   : > { %v1110_v26 = vadd.f32 %v1987_v23, %v2778_v46  ;;  %v1101_v45 = vpop.f32.mrb[13].mxu0  ;;  %1517 = vmatmul.mubr.bf16.vlgmr.msra.gmra.mrb[0].mxu1 %v1286_v20  ;;  %v1295_v20 = vpack.c.bf16 %v1263_v38, %v1262_v58  ;;  %v1233_v23 = vld [vmem:[%s2759_s12 + $0xa8] sm:$0xff]  ;;  %v1243_v58 = vld [vmem:[%s2759_s12 + $0xf8] sm:$0xff] }
 0x243   : > { %v1102_v5 = vadd.f32 %v2778_v46, %v1101_v45  ;;  %v1988_v61 = vpop.f32.mrb[14].mxu0  ;;  %1493 = vmatmul.mubr.bf16.gmra.mrb[40].mxu0 %v1280_v41  ;;  %1931 = vmatprep.mubr.msk.bf16.mxu1 %vm1395_vm1, %v1289_v60  ;;  %v1265_v43 = vmax.f32 %v1233_v23, 0.0 }
 0x244   : > { %v1113_v2 = vadd.f32 %v1988_v61, %v2778_v46  ;;  %v1104_v12 = vpop.f32.mrb[15].mxu0  ;;  %1928 = vmatprep.mubr.msk.bf16.mxu0 %vm1395_vm1, %v1283_v34  ;;  %v1194_v7 = vmax.f32 %v1110_v26, 0.0 }
 0x245   : > { %v1105_v47 = vadd.f32 %v2778_v46, %v1104_v12  ;;  %v1192_v48 = vmax.f32 %v1102_v5, 0.0 }
 0x246   : > { %v1195_v36 = vmax.f32 %v1113_v2, 0.0 }
 0x247   : > { %v1193_v56 = vmax.f32 %v1105_v47, 0.0 }
 0x248   : > { %v1290_v37 = vpack.c.bf16 %v1195_v36, %v1194_v7 }
 0x249   : > { %v1288_v55 = vpack.c.bf16 %v1193_v56, %v1192_v48  ;;  %v1991_v30 = vpop.f32.mrb[16].mxu0  ;;  %v1234_v56 = vld [vmem:[%s2759_s12 + $0xb0] sm:$0xff] }
 0x24a   : > { %v1126_v16 = vadd.f32 %v1991_v30, %v2778_v46  ;;  %v1117_v53 = vpop.f32.mrb[17].mxu0 }
 0x24b   : > { %v1118_v10 = vadd.f32 %v2778_v46, %v1117_v53  ;;  %v1992_v63 = vpop.f32.mrb[18].mxu0  ;;  %1501 = vmatmul.mubr.bf16.gmra.mrb[44].mxu0 %v2793_v21  ;;  %1525 = vmatmul.mubr.bf16.gmra.mrb[4].mxu1 %v1288_v55  ;;  %v1293_v21 = vpack.c.bf16 %v1261_v28, %v1260_v32 }
 0x24c   : > { %v1129_v44 = vadd.f32 %v1992_v63, %v2778_v46  ;;  %v1120_v50 = vpop.f32.mrb[19].mxu0  ;;  %1929 = vmatprep.mubr.msk.bf16.mxu0 %vm1395_vm1, %v1285_v1  ;;  %1932 = vmatprep.mubr.msk.bf16.mxu1 %vm1395_vm1, %v1291_v18  ;;  %v1198_v33 = vmax.f32 %v1126_v16, 0.0  ;;  %v1266_v16 = vmax.f32 %v1234_v56, 0.0 }
 0x24d   : > { %v1121_v39 = vadd.f32 %v2778_v46, %v1120_v50  ;;  %v1196_v4 = vmax.f32 %v1118_v10, 0.0 }
 0x24e   : > { %v1199_v0 = vmax.f32 %v1129_v44, 0.0 }
 0x24f   : > { %v1197_v41 = vmax.f32 %v1121_v39, 0.0 }
 0x250   : > { %v1294_v25 = vpack.c.bf16 %v1199_v0, %v1198_v33  ;;  %v1236_v0 = vld [vmem:[%s2759_s12 + $0xc0] sm:$0xff] }
 0x251   : > { %v1292_v42 = vpack.c.bf16 %v1197_v41, %v1196_v4  ;;  %v1995_v35 = vpop.f32.mrb[20].mxu0  ;;  %v1237_v4 = vld [vmem:[%s2759_s12 + $0xc8] sm:$0xff]  ;;  %v1268_v41 = vmax.f32 %v1236_v0, 0.0 }
 0x252   : > { %v1142_v22 = vadd.f32 %v1995_v35, %v2778_v46  ;;  %v1133_v11 = vpop.f32.mrb[21].mxu0 }
 0x253   : > { %v1134_v62 = vadd.f32 %v2778_v46, %v1133_v11  ;;  %v1996_v29 = vpop.f32.mrb[22].mxu0  ;;  %1509 = vmatmul.mubr.bf16.gmra.mrb[48].mxu0 %v1284_v52  ;;  %1533 = vmatmul.mubr.bf16.gmra.mrb[8].mxu1 %v1290_v37  ;;  %v1232_v52 = vld [vmem:[%s2759_s12 + $0xa0] sm:$0xff]  ;;  %v1235_v37 = vld [vmem:[%s2759_s12 + $0xb8] sm:$0xff]  ;;  %v1241_v11 = vld [vmem:[%s2759_s12 + $0xe8] sm:$0xff] }
 0x254   : > { %v1145_v3 = vadd.f32 %v1996_v29, %v2778_v46  ;;  %v1136_v13 = vpop.f32.mrb[23].mxu0  ;;  %1933 = vmatprep.mubr.msk.bf16.mxu1 %vm1395_vm1, %v1293_v21  ;;  %v1202_v51 = vmax.f32 %v1142_v22, 0.0  ;;  %v1264_v61 = vmax.f32 %v1232_v52, 0.0  ;;  %v1267_v53 = vmax.f32 %v1235_v37, 0.0  ;;  %v1240_v22 = vld [vmem:[%s2759_s12 + $0xe0] sm:$0xff] }
 0x255   : > { %v1137_v15 = vadd.f32 %v2778_v46, %v1136_v13  ;;  %v1200_v40 = vmax.f32 %v1134_v62, 0.0  ;;  %v1272_v62 = vmax.f32 %v1240_v22, 0.0  ;;  %v1273_v29 = vmax.f32 %v1241_v11, 0.0  ;;  %v1242_v13 = vld [vmem:[%s2759_s12 + $0xf0] sm:$0xff] }
 0x256   : > { %v1203_v57 = vmax.f32 %v1145_v3, 0.0  ;;  %v1297_v7 = vpack.c.bf16 %v1265_v43, %v1264_v61  ;;  %v1299_v39 = vpack.c.bf16 %v1267_v53, %v1266_v16  ;;  %v1274_v38 = vmax.f32 %v1242_v13, 0.0 }
 0x257   : > { %v1201_v19 = vmax.f32 %v1137_v15, 0.0  ;;  %v1305_v3 = vpack.c.bf16 %v1273_v29, %v1272_v62  ;;  %v1275_v15 = vmax.f32 %v1243_v58, 0.0 }
 0x258   : > { %v1298_v60 = vpack.c.bf16 %v1203_v57, %v1202_v51  ;;  %v2860_v57 = vld [vmem:[%s3045_s7] ss:$0 sm:$0xff] }
 0x259   : > { %v1296_v34 = vpack.c.bf16 %v1201_v19, %v1200_v40  ;;  %v1999_v14 = vpop.f32.mrb[24].mxu0  ;;  %v1307_v51 = vpack.c.bf16 %v1275_v15, %v1274_v38 }
 0x25a   : > { %v1158_v24 = vadd.f32 %v1999_v14, %v2778_v46  ;;  %v1149_v6 = vpop.f32.mrb[25].mxu0 }
 0x25b   : > { %v1150_v27 = vadd.f32 %v2778_v46, %v1149_v6  ;;  %v2000_v26 = vpop.f32.mrb[26].mxu0  ;;  %1541 = vmatmul.mubr.bf16.gmra.mrb[12].mxu1 %v1292_v42  ;;  %v1239_v42 = vld [vmem:[%s2759_s12 + $0xd8] sm:$0xff] }
 0x25c   : > { %v1161_v45 = vadd.f32 %v2000_v26, %v2778_v46  ;;  %v1152_v5 = vpop.f32.mrb[27].mxu0  ;;  %1934 = vmatprep.mubr.msk.bf16.mxu1 %vm1395_vm1, %v1295_v20  ;;  %v1206_v12 = vmax.f32 %v1158_v24, 0.0  ;;  %v1271_v54 = vmax.f32 %v1239_v42, 0.0 }
 0x25d   : > { %v1153_v2 = vadd.f32 %v2778_v46, %v1152_v5  ;;  %v1204_v49 = vmax.f32 %v1150_v27, 0.0 }
 0x25e   : > { %v1207_v31 = vmax.f32 %v1161_v45, 0.0 }
 0x25f   : > { %v1205_v17 = vmax.f32 %v1153_v2, 0.0 }
 0x260   : > { %v1302_v47 = vpack.c.bf16 %v1207_v31, %v1206_v12 }
 0x261   : > { %v1300_v36 = vpack.c.bf16 %v1205_v17, %v1204_v49  ;;  %v2003_v48 = vpop.f32.mrb[28].mxu0 }
 0x262   : > { %v1174_v1 = vadd.f32 %v2003_v48, %v2778_v46  ;;  %v1165_v18 = vpop.f32.mrb[29].mxu0 }
 0x263   : > { %v1166_v55 = vadd.f32 %v2778_v46, %v1165_v18  ;;  %v2004_v30 = vpop.f32.mrb[30].mxu0  ;;  %1549 = vmatmul.mubr.bf16.gmra.mrb[16].mxu1 %v1294_v25  ;;  %v1269_v25 = vmax.f32 %v1237_v4, 0.0 }
 0x264   : > { %v1177_v9 = vadd.f32 %v2004_v30, %v2778_v46  ;;  %v1168_v59 = vpop.f32.mrb[31].mxu0  ;;  %1935 = vmatprep.mubr.msk.bf16.mxu1 %vm1395_vm1, %v1297_v7  ;;  %v1210_v63 = vmax.f32 %v1174_v1, 0.0 }
 0x265   : > { %v1169_v10 = vadd.f32 %v2778_v46, %v1168_v59  ;;  %v1208_v50 = vmax.f32 %v1166_v55, 0.0  ;;  %v1301_v21 = vpack.c.bf16 %v1269_v25, %v1268_v41  ;;  %v1238_v46 = vld [vmem:[%s2759_s12 + $0xd0] sm:$0xff] }
 0x266   : > { %v1211_v44 = vmax.f32 %v1177_v9, 0.0  ;;  %v1270_v35 = vmax.f32 %v1238_v46, 0.0 }
 0x267   : > { %v1209_v32 = vmax.f32 %v1169_v10, 0.0 }
 0x268   : > { %v1306_v28 = vpack.c.bf16 %v1211_v44, %v1210_v63  ;;  %v1303_v8 = vpack.c.bf16 %v1271_v54, %v1270_v35 }
 0x269   : > { %v1304_v33 = vpack.c.bf16 %v1209_v32, %v1208_v50 }
 0x26b   : > { %1557 = vmatmul.mubr.bf16.gmra.mrb[20].mxu1 %v1296_v34  ;;  %v2866_v34 = vld [vmem:[%s3046_s8] ss:$0 sm:$0xff] }
 0x26c   : > { %1936 = vmatprep.mubr.msk.bf16.mxu1 %vm1395_vm1, %v1299_v39 }
 0x273   : > { %1565 = vmatmul.mubr.bf16.gmra.mrb[24].mxu1 %v1298_v60 }
 0x274   : > { %1937 = vmatprep.mubr.msk.bf16.mxu1 %vm1395_vm1, %v1301_v21 }
 0x27b   : > { %1573 = vmatmul.mubr.bf16.gmra.mrb[28].mxu1 %v1300_v36 }
 0x27c   : > { %1938 = vmatprep.mubr.msk.bf16.mxu1 %vm1395_vm1, %v1303_v8 }
 0x283   : > { %1581 = vmatmul.mubr.bf16.gmra.mrb[32].mxu1 %v1302_v47 }
 0x284   : > { %1939 = vmatprep.mubr.msk.bf16.mxu1 %vm1395_vm1, %v1305_v3 }
 0x28b   : > { %1589 = vmatmul.mubr.bf16.gmra.mrb[36].mxu1 %v1304_v33 }
 0x28c   : > { %1940 = vmatprep.mubr.msk.bf16.mxu1 %vm1395_vm1, %v1307_v51 }
 0x293   : > { %1597 = vmatmul.mubr.bf16.gmra.mrb[40].mxu1 %v1306_v28 }
 0x306   : > { %v1478_v40 = vpop.f32.mrb[32].mxu0 }
 0x307   : > { %v1479_v19 = vadd.f32 %v2860_v57, %v1478_v40  ;;  %v1480_v60 = vpop.f32.mrb[33].mxu0 }
 0x308   : > { %v1481_v20 = vpop.f32.mrb[34].mxu0 }
 0x309   : > { %v1605_v14 = vmax.f32 %v1479_v19, 0.0  ;;  %v1482_v52 = vadd.f32 %v2860_v57, %v1481_v20  ;;  %v1483_v23 = vpop.f32.mrb[35].mxu0 }
 0x30b   : > { %v1606_v24 = vmax.f32 %v1482_v52, 0.0  ;;  %v1644_v6 = vmul.f32 %v2866_v34, %v1605_v14 }
 0x30d   : > { %1676 = vadd.xlane.f32.xlu0 %v1644_v6  ;;  %v1645_v27 = vmul.f32 %v2866_v34, %v1606_v24 }
 0x30e   : > { %v1486_v26 = vpop.f32.mrb[36].mxu0 }
 0x30f   : > { %v1487_v45 = vadd.f32 %v2860_v57, %v1486_v26  ;;  %v1488_v5 = vpop.f32.mrb[37].mxu0  ;;  %1678 = vadd.xlane.f32.xlu1 %v1645_v27 }
 0x310   : > { %v1489_v61 = vpop.f32.mrb[38].mxu0 }
 0x311   : > { %v1607_v43 = vmax.f32 %v1487_v45, 0.0  ;;  %v1490_v2 = vadd.f32 %v2860_v57, %v1489_v61  ;;  %v1491_v12 = vpop.f32.mrb[39].mxu0 }
 0x313   : > { %v1608_v31 = vmax.f32 %v1490_v2, 0.0  ;;  %v1646_v49 = vmul.f32 %v2866_v34, %v1607_v43 }
 0x315   : > { %v1518_v17 = vpop.f32.mrb[0].mxu1  ;;  %1680 = vadd.xlane.f32.xlu0 %v1646_v49  ;;  %v1647_v47 = vmul.f32 %v2866_v34, %v1608_v31 }
 0x316   : > { %v1519_v7 = vadd.f32 %v2860_v57, %v1518_v17  ;;  %v1494_v36 = vpop.f32.mrb[40].mxu0  ;;  %v1520_v48 = vpop.f32.mrb[1].mxu1 }
 0x317   : > { %v1495_v56 = vadd.f32 %v2860_v57, %v1494_v36  ;;  %v1496_v37 = vpop.f32.mrb[41].mxu0  ;;  %v1521_v1 = vpop.f32.mrb[2].mxu1  ;;  %1682 = vadd.xlane.f32.xlu1 %v1647_v47 }
 0x318   : > { %v1615_v18 = vmax.f32 %v1519_v7, 0.0  ;;  %v1522_v55 = vadd.f32 %v2860_v57, %v1521_v1  ;;  %v1497_v30 = vpop.f32.mrb[42].mxu0  ;;  %v1523_v9 = vpop.f32.mrb[3].mxu1 }
 0x319   : > { %v1498_v59 = vadd.f32 %v2860_v57, %v1497_v30  ;;  %v1499_v16 = vpop.f32.mrb[43].mxu0  ;;  %v1609_v53 = vmax.f32 %v1495_v56, 0.0 }
 0x31a   : > { %v1616_v10 = vmax.f32 %v1522_v55, 0.0  ;;  %v1654_v63 = vmul.f32 %v2866_v34, %v1615_v18 }
 0x31b   : > { %v1610_v44 = vmax.f32 %v1498_v59, 0.0  ;;  %v1648_v39 = vmul.f32 %v2866_v34, %v1609_v53 }
 0x31c   : > { %1696 = vadd.xlane.f32.xlu0 %v1654_v63  ;;  %v1655_v50 = vmul.f32 %v2866_v34, %v1616_v10 }
 0x31d   : > { %v1649_v46 = vmul.f32 %v2866_v34, %v1610_v44 }
 0x31e   : > { %v1502_v32 = vpop.f32.mrb[44].mxu0  ;;  %v1526_v28 = vpop.f32.mrb[4].mxu1  ;;  %1698 = vadd.xlane.f32.xlu1 %v1655_v50 }
 0x31f   : > { %v1503_v33 = vadd.f32 %v2860_v57, %v1502_v32  ;;  %v1527_v0 = vadd.f32 %v2860_v57, %v1526_v28  ;;  %v1504_v4 = vpop.f32.mrb[45].mxu0  ;;  %v1528_v41 = vpop.f32.mrb[5].mxu1 }
 0x320   : > { %v1505_v25 = vpop.f32.mrb[46].mxu0  ;;  %v1529_v21 = vpop.f32.mrb[6].mxu1  ;;  %1684 = vadd.xlane.f32.xlu0 %v1648_v39 }
 0x321   : > { %v1611_v42 = vmax.f32 %v1503_v33, 0.0  ;;  %v1506_v35 = vadd.f32 %v2860_v57, %v1505_v25  ;;  %v1530_v54 = vadd.f32 %v2860_v57, %v1529_v21  ;;  %v1507_v8 = vpop.f32.mrb[47].mxu0  ;;  %v1531_v22 = vpop.f32.mrb[7].mxu1  ;;  %v1617_v11 = vmax.f32 %v1527_v0, 0.0 }
 0x322   : > { %1686 = vadd.xlane.f32.xlu1 %v1649_v46 }
 0x323   : > { %v1612_v62 = vmax.f32 %v1506_v35, 0.0  ;;  %v1650_v29 = vmul.f32 %v2866_v34, %v1611_v42  ;;  %v1618_v3 = vmax.f32 %v1530_v54, 0.0  ;;  %v1656_v60 = vmul.f32 %v2866_v34, %v1617_v11 }
 0x325   : > { %1688 = vadd.xlane.f32.xlu0 %v1650_v29  ;;  %v1651_v13 = vmul.f32 %v2866_v34, %v1612_v62  ;;  %v1657_v26 = vmul.f32 %v2866_v34, %v1618_v3 }
 0x326   : > { %v1510_v58 = vpop.f32.mrb[48].mxu0  ;;  %v1534_v38 = vpop.f32.mrb[8].mxu1 }
 0x327   : > { %v1511_v15 = vadd.f32 %v2860_v57, %v1510_v58  ;;  %v1535_v51 = vadd.f32 %v2860_v57, %v1534_v38  ;;  %v1512_v40 = vpop.f32.mrb[49].mxu0  ;;  %v1536_v19 = vpop.f32.mrb[9].mxu1  ;;  %1690 = vadd.xlane.f32.xlu1 %v1651_v13 }
 0x328   : > { %v1513_v20 = vpop.f32.mrb[50].mxu0  ;;  %v1537_v14 = vpop.f32.mrb[10].mxu1 }
 0x329   : > { %v1613_v52 = vmax.f32 %v1511_v15, 0.0  ;;  %v1514_v23 = vadd.f32 %v2860_v57, %v1513_v20  ;;  %v1538_v24 = vadd.f32 %v2860_v57, %v1537_v14  ;;  %v1515_v6 = vpop.f32.mrb[51].mxu0  ;;  %v1539_v27 = vpop.f32.mrb[11].mxu1  ;;  %1700 = vadd.xlane.f32.xlu0 %v1656_v60  ;;  %v1619_v45 = vmax.f32 %v1535_v51, 0.0 }
 0x32b   : > { %v1614_v5 = vmax.f32 %v1514_v23, 0.0  ;;  %1702 = vadd.xlane.f32.xlu1 %v1657_v26  ;;  %v1652_v61 = vmul.f32 %v2866_v34, %v1613_v52  ;;  %v1620_v43 = vmax.f32 %v1538_v24, 0.0  ;;  %v1658_v17 = vmul.f32 %v2866_v34, %v1619_v45 }
 0x32d   : > { %1692 = vadd.xlane.f32.xlu0 %v1652_v61  ;;  %v1653_v2 = vmul.f32 %v2866_v34, %v1614_v5  ;;  %v1659_v56 = vmul.f32 %v2866_v34, %v1620_v43 }
 0x32e   : > { %v1542_v12 = vpop.f32.mrb[12].mxu1 }
 0x32f   : > { %v1543_v31 = vadd.f32 %v2860_v57, %v1542_v12  ;;  %v1544_v49 = vpop.f32.mrb[13].mxu1  ;;  %1694 = vadd.xlane.f32.xlu1 %v1653_v2 }
 0x330   : > { %v1545_v47 = vpop.f32.mrb[14].mxu1 }
 0x331   : > { %v1621_v7 = vmax.f32 %v1543_v31, 0.0  ;;  %v1546_v36 = vadd.f32 %v2860_v57, %v1545_v47  ;;  %v1547_v48 = vpop.f32.mrb[15].mxu1  ;;  %1704 = vadd.xlane.f32.xlu0 %v1658_v17 }
 0x333   : > { %v1622_v37 = vmax.f32 %v1546_v36, 0.0  ;;  %1706 = vadd.xlane.f32.xlu1 %v1659_v56  ;;  %v1660_v1 = vmul.f32 %v2866_v34, %v1621_v7 }
 0x335   : > { %1708 = vadd.xlane.f32.xlu0 %v1660_v1  ;;  %v1661_v18 = vmul.f32 %v2866_v34, %v1622_v37 }
 0x336   : > { %v1550_v55 = vpop.f32.mrb[16].mxu1 }
 0x337   : > { %v1551_v30 = vadd.f32 %v2860_v57, %v1550_v55  ;;  %v1552_v9 = vpop.f32.mrb[17].mxu1  ;;  %1710 = vadd.xlane.f32.xlu1 %v1661_v18 }
 0x338   : > { %v1553_v59 = vpop.f32.mrb[18].mxu1 }
 0x339   : > { %v1623_v16 = vmax.f32 %v1551_v30, 0.0  ;;  %v1554_v53 = vadd.f32 %v2860_v57, %v1553_v59  ;;  %v1555_v10 = vpop.f32.mrb[19].mxu1 }
 0x33b   : > { %v1624_v63 = vmax.f32 %v1554_v53, 0.0  ;;  %v1662_v44 = vmul.f32 %v2866_v34, %v1623_v16 }
 0x33d   : > { %1712 = vadd.xlane.f32.xlu0 %v1662_v44  ;;  %v1663_v50 = vmul.f32 %v2866_v34, %v1624_v63  ;;  %v2931_v44 = vld [vmem:[#allocation2] ss:$0 sm:$0xff] }
 0x33e   : > { %v1558_v32 = vpop.f32.mrb[20].mxu1 }
 0x33f   : > { %v1559_v28 = vadd.f32 %v2860_v57, %v1558_v32  ;;  %v1560_v39 = vpop.f32.mrb[21].mxu1  ;;  %1714 = vadd.xlane.f32.xlu1 %v1663_v50 }
 0x340   : > { %v1561_v33 = vpop.f32.mrb[22].mxu1 }
 0x341   : > { %v1625_v0 = vmax.f32 %v1559_v28, 0.0  ;;  %v1562_v4 = vadd.f32 %v2860_v57, %v1561_v33  ;;  %v1563_v41 = vpop.f32.mrb[23].mxu1 }
 0x343   : > { %v1626_v25 = vmax.f32 %v1562_v4, 0.0  ;;  %v1664_v21 = vmul.f32 %v2866_v34, %v1625_v0 }
 0x345   : > { %1716 = vadd.xlane.f32.xlu0 %v1664_v21  ;;  %v1665_v46 = vmul.f32 %v2866_v34, %v1626_v25 }
 0x346   : > { %v1566_v42 = vpop.f32.mrb[24].mxu1 }
 0x347   : > { %v1567_v35 = vadd.f32 %v2860_v57, %v1566_v42  ;;  %v1568_v54 = vpop.f32.mrb[25].mxu1  ;;  %1718 = vadd.xlane.f32.xlu1 %v1665_v46 }
 0x348   : > { %v1569_v8 = vpop.f32.mrb[26].mxu1 }
 0x349   : > { %v1627_v22 = vmax.f32 %v1567_v35, 0.0  ;;  %v1570_v11 = vadd.f32 %v2860_v57, %v1569_v8  ;;  %v1571_v62 = vpop.f32.mrb[27].mxu1 }
 0x34b   : > { %v1628_v29 = vmax.f32 %v1570_v11, 0.0  ;;  %v1666_v3 = vmul.f32 %v2866_v34, %v1627_v22 }
 0x34d   : > { %1720 = vadd.xlane.f32.xlu0 %v1666_v3  ;;  %v1667_v13 = vmul.f32 %v2866_v34, %v1628_v29 }
 0x34e   : > { %v1574_v58 = vpop.f32.mrb[28].mxu1 }
 0x34f   : > { %v1575_v38 = vadd.f32 %v2860_v57, %v1574_v58  ;;  %v1576_v15 = vpop.f32.mrb[29].mxu1  ;;  %1722 = vadd.xlane.f32.xlu1 %v1667_v13 }
 0x350   : > { %v1577_v51 = vpop.f32.mrb[30].mxu1 }
 0x351   : > { %v1629_v40 = vmax.f32 %v1575_v38, 0.0  ;;  %v1578_v19 = vadd.f32 %v2860_v57, %v1577_v51  ;;  %v1579_v60 = vpop.f32.mrb[31].mxu1 }
 0x353   : > { %v1630_v20 = vmax.f32 %v1578_v19, 0.0  ;;  %v1668_v14 = vmul.f32 %v2866_v34, %v1629_v40 }
 0x355   : > { %1724 = vadd.xlane.f32.xlu0 %v1668_v14  ;;  %v1669_v52 = vmul.f32 %v2866_v34, %v1630_v20 }
 0x356   : > { %v1582_v23 = vpop.f32.mrb[32].mxu1 }
 0x357   : > { %v1583_v24 = vadd.f32 %v2860_v57, %v1582_v23  ;;  %v1584_v6 = vpop.f32.mrb[33].mxu1  ;;  %1726 = vadd.xlane.f32.xlu1 %v1669_v52 }
 0x358   : > { %v1585_v27 = vpop.f32.mrb[34].mxu1 }
 0x359   : > { %v1631_v26 = vmax.f32 %v1583_v24, 0.0  ;;  %v1586_v45 = vadd.f32 %v2860_v57, %v1585_v27  ;;  %v1587_v5 = vpop.f32.mrb[35].mxu1 }
 0x35b   : > { %v1632_v61 = vmax.f32 %v1586_v45, 0.0  ;;  %v1670_v43 = vmul.f32 %v2866_v34, %v1631_v26 }
 0x35d   : > { %1728 = vadd.xlane.f32.xlu0 %v1670_v43  ;;  %v1671_v2 = vmul.f32 %v2866_v34, %v1632_v61 }
 0x35e   : > { %v1590_v12 = vpop.f32.mrb[36].mxu1 }
 0x35f   : > { %v1591_v31 = vadd.f32 %v2860_v57, %v1590_v12  ;;  %1730 = vadd.xlane.f32.xlu1 %v1671_v2  ;;  %v1592_v49 = vpop.f32.mrb[37].mxu1 }
 0x360   : > { %v1593_v17 = vpop.f32.mrb[38].mxu1 }
 0x361   : > { %v1633_v47 = vmax.f32 %v1591_v31, 0.0  ;;  %v1594_v7 = vadd.f32 %v2860_v57, %v1593_v17  ;;  %v1595_v36 = vpop.f32.mrb[39].mxu1 }
 0x363   : > { %v1634_v48 = vmax.f32 %v1594_v7, 0.0  ;;  %v1672_v56 = vmul.f32 %v2866_v34, %v1633_v47 }
 0x365   : > { %1732 = vadd.xlane.f32.xlu0 %v1672_v56  ;;  %v1673_v37 = vmul.f32 %v2866_v34, %v1634_v48 }
 0x366   : > { %v1598_v1 = vpop.f32.mrb[40].mxu1 }
 0x367   : > { %v1599_v18 = vadd.f32 %v2860_v57, %v1598_v1  ;;  %v1600_v55 = vpop.f32.mrb[41].mxu1  ;;  %1734 = vadd.xlane.f32.xlu1 %v1673_v37 }
 0x368   : > { %v1601_v30 = vpop.f32.mrb[42].mxu1 }
 0x369   : > { %v1635_v9 = vmax.f32 %v1599_v18, 0.0  ;;  %v1602_v59 = vadd.f32 %v2860_v57, %v1601_v30  ;;  %v1603_v16 = vpop.f32.mrb[43].mxu1 }
 0x36b   : > { %v1636_v53 = vmax.f32 %v1602_v59, 0.0  ;;  %v1674_v10 = vmul.f32 %v2866_v34, %v1635_v9 }
 0x36d   : > { %1736 = vadd.xlane.f32.xlu0 %v1674_v10  ;;  %v1675_v63 = vmul.f32 %v2866_v34, %v1636_v53 }
 0x36f   : > { %1738 = vadd.xlane.f32.xlu1 %v1675_v63 }
 0x39a   : > { %v1677_v57 = vpop.xlane.xlu0 %1676 }
 0x39b   : > { %v1747_v50 = vadd.f32 %v2931_v44, %v1677_v57 }
 0x39c   : > { %v1679_v32 = vpop.xlane.xlu1 %1678 }
 0x39d   : > { %1780 = vst.msk [vmem:[%s2937_s26] sm:$0xff] %vm1779_vm2, %v1747_v50  ;;  %v1748_v34 = vadd.f32 %v2931_v44, %v1679_v32 }
 0x39f   : > { %1781 = vst.msk [vmem:[%s2937_s26 + $0x8] sm:$0xff] %vm1779_vm2, %v1748_v34 }
 0x3a2   : > { %v1681_v28 = vpop.xlane.xlu0 %1680 }
 0x3a3   : > { %v1749_v39 = vadd.f32 %v2931_v44, %v1681_v28 }
 0x3a4   : > { %v1683_v33 = vpop.xlane.xlu1 %1682 }
 0x3a5   : > { %1782 = vst.msk [vmem:[%s2937_s26 + $0x10] sm:$0xff] %vm1779_vm2, %v1749_v39  ;;  %v1750_v0 = vadd.f32 %v2931_v44, %v1683_v33 }
 0x3a7   : > { %1783 = vst.msk [vmem:[%s2937_s26 + $0x18] sm:$0xff] %vm1779_vm2, %v1750_v0 }
 0x3a9   : > { %v1697_v4 = vpop.xlane.xlu0 %1696 }
 0x3aa   : > { %v1757_v41 = vadd.f32 %v2931_v44, %v1697_v4 }
 0x3ab   : > { %v1699_v25 = vpop.xlane.xlu1 %1698 }
 0x3ac   : > { %1790 = vst.msk [vmem:[%s2937_s26 + $0x50] sm:$0xff] %vm1779_vm2, %v1757_v41  ;;  %v1758_v21 = vadd.f32 %v2931_v44, %v1699_v25 }
 0x3ad   : > { %v1685_v46 = vpop.xlane.xlu0 %1684 }
 0x3ae   : > { %1791 = vst.msk [vmem:[%s2937_s26 + $0x58] sm:$0xff] %vm1779_vm2, %v1758_v21  ;;  %v1751_v42 = vadd.f32 %v2931_v44, %v1685_v46 }
 0x3af   : > { %v1687_v35 = vpop.xlane.xlu1 %1686 }
 0x3b0   : > { %1784 = vst.msk [vmem:[%s2937_s26 + $0x20] sm:$0xff] %vm1779_vm2, %v1751_v42  ;;  %v1752_v54 = vadd.f32 %v2931_v44, %v1687_v35 }
 0x3b2   : > { %1785 = vst.msk [vmem:[%s2937_s26 + $0x28] sm:$0xff] %vm1779_vm2, %v1752_v54  ;;  %v1689_v8 = vpop.xlane.xlu0 %1688 }
 0x3b3   : > { %v1753_v22 = vadd.f32 %v2931_v44, %v1689_v8 }
 0x3b4   : > { %v1691_v11 = vpop.xlane.xlu1 %1690 }
 0x3b5   : > { %1786 = vst.msk [vmem:[%s2937_s26 + $0x30] sm:$0xff] %vm1779_vm2, %v1753_v22  ;;  %v1754_v62 = vadd.f32 %v2931_v44, %v1691_v11 }
 0x3b6   : > { %v1701_v29 = vpop.xlane.xlu0 %1700 }
 0x3b7   : > { %1787 = vst.msk [vmem:[%s2937_s26 + $0x38] sm:$0xff] %vm1779_vm2, %v1754_v62  ;;  %v1759_v3 = vadd.f32 %v2931_v44, %v1701_v29 }
 0x3b8   : > { %v1703_v13 = vpop.xlane.xlu1 %1702 }
 0x3b9   : > { %1792 = vst.msk [vmem:[%s2937_s26 + $0x60] sm:$0xff] %vm1779_vm2, %v1759_v3  ;;  %v1760_v58 = vadd.f32 %v2931_v44, %v1703_v13 }
 0x3ba   : > { %v1693_v38 = vpop.xlane.xlu0 %1692 }
 0x3bb   : > { %1793 = vst.msk [vmem:[%s2937_s26 + $0x68] sm:$0xff] %vm1779_vm2, %v1760_v58  ;;  %v1755_v15 = vadd.f32 %v2931_v44, %v1693_v38 }
 0x3bc   : > { %v1695_v51 = vpop.xlane.xlu1 %1694 }
 0x3bd   : > { %1788 = vst.msk [vmem:[%s2937_s26 + $0x40] sm:$0xff] %vm1779_vm2, %v1755_v15  ;;  %v1756_v40 = vadd.f32 %v2931_v44, %v1695_v51 }
 0x3be   : > { %v1705_v19 = vpop.xlane.xlu0 %1704 }
 0x3bf   : > { %1789 = vst.msk [vmem:[%s2937_s26 + $0x48] sm:$0xff] %vm1779_vm2, %v1756_v40  ;;  %v1761_v60 = vadd.f32 %v2931_v44, %v1705_v19 }
 0x3c0   : > { %v1707_v20 = vpop.xlane.xlu1 %1706 }
 0x3c1   : > { %1794 = vst.msk [vmem:[%s2937_s26 + $0x70] sm:$0xff] %vm1779_vm2, %v1761_v60  ;;  %v1762_v14 = vadd.f32 %v2931_v44, %v1707_v20 }
 0x3c2   : > { %v1709_v52 = vpop.xlane.xlu0 %1708 }
 0x3c3   : > { %1795 = vst.msk [vmem:[%s2937_s26 + $0x78] sm:$0xff] %vm1779_vm2, %v1762_v14  ;;  %v1763_v23 = vadd.f32 %v2931_v44, %v1709_v52 }
 0x3c4   : > { %v1711_v24 = vpop.xlane.xlu1 %1710 }
 0x3c5   : > { %1796 = vst.msk [vmem:[%s2937_s26 + $0x80] sm:$0xff] %vm1779_vm2, %v1763_v23  ;;  %v1764_v6 = vadd.f32 %v2931_v44, %v1711_v24 }
 0x3c7   : > { %1797 = vst.msk [vmem:[%s2937_s26 + $0x88] sm:$0xff] %vm1779_vm2, %v1764_v6 }
 0x3ca   : > { %v1713_v27 = vpop.xlane.xlu0 %1712 }
 0x3cb   : > { %v1765_v26 = vadd.f32 %v2931_v44, %v1713_v27 }
 0x3cc   : > { %v1715_v45 = vpop.xlane.xlu1 %1714 }
 0x3cd   : > { %1798 = vst.msk [vmem:[%s2937_s26 + $0x90] sm:$0xff] %vm1779_vm2, %v1765_v26  ;;  %v1766_v5 = vadd.f32 %v2931_v44, %v1715_v45 }
 0x3cf   : > { %1799 = vst.msk [vmem:[%s2937_s26 + $0x98] sm:$0xff] %vm1779_vm2, %v1766_v5 }
 0x3d2   : > { %v1717_v61 = vpop.xlane.xlu0 %1716 }
 0x3d3   : > { %v1767_v43 = vadd.f32 %v2931_v44, %v1717_v61 }
 0x3d4   : > { %v1719_v2 = vpop.xlane.xlu1 %1718 }
 0x3d5   : > { %1800 = vst.msk [vmem:[%s2937_s26 + $0xa0] sm:$0xff] %vm1779_vm2, %v1767_v43  ;;  %v1768_v12 = vadd.f32 %v2931_v44, %v1719_v2 }
 0x3d7   : > { %1801 = vst.msk [vmem:[%s2937_s26 + $0xa8] sm:$0xff] %vm1779_vm2, %v1768_v12 }
 0x3da   : > { %v1721_v31 = vpop.xlane.xlu0 %1720 }
 0x3db   : > { %v1769_v49 = vadd.f32 %v2931_v44, %v1721_v31 }
 0x3dc   : > { %v1723_v17 = vpop.xlane.xlu1 %1722 }
 0x3dd   : > { %1802 = vst.msk [vmem:[%s2937_s26 + $0xb0] sm:$0xff] %vm1779_vm2, %v1769_v49  ;;  %v1770_v47 = vadd.f32 %v2931_v44, %v1723_v17 }
 0x3df   : > { %1803 = vst.msk [vmem:[%s2937_s26 + $0xb8] sm:$0xff] %vm1779_vm2, %v1770_v47 }
 0x3e2   : > { %v1725_v7 = vpop.xlane.xlu0 %1724 }
 0x3e3   : > { %v1771_v36 = vadd.f32 %v2931_v44, %v1725_v7 }
 0x3e4   : > { %v1727_v48 = vpop.xlane.xlu1 %1726 }
 0x3e5   : > { %1804 = vst.msk [vmem:[%s2937_s26 + $0xc0] sm:$0xff] %vm1779_vm2, %v1771_v36  ;;  %v1772_v56 = vadd.f32 %v2931_v44, %v1727_v48 }
 0x3e7   : > { %1805 = vst.msk [vmem:[%s2937_s26 + $0xc8] sm:$0xff] %vm1779_vm2, %v1772_v56 }
 0x3ea   : > { %v1729_v37 = vpop.xlane.xlu0 %1728 }
 0x3eb   : > { %v1773_v1 = vadd.f32 %v2931_v44, %v1729_v37 }
 0x3ec   : > { %v1731_v18 = vpop.xlane.xlu1 %1730 }
 0x3ed   : > { %1806 = vst.msk [vmem:[%s2937_s26 + $0xd0] sm:$0xff] %vm1779_vm2, %v1773_v1  ;;  %v1774_v55 = vadd.f32 %v2931_v44, %v1731_v18 }
 0x3ef   : > { %1807 = vst.msk [vmem:[%s2937_s26 + $0xd8] sm:$0xff] %vm1779_vm2, %v1774_v55 }
 0x3f2   : > { %v1733_v30 = vpop.xlane.xlu0 %1732 }
 0x3f3   : > { %v1775_v9 = vadd.f32 %v2931_v44, %v1733_v30 }
 0x3f4   : > { %v1735_v59 = vpop.xlane.xlu1 %1734 }
 0x3f5   : > { %1808 = vst.msk [vmem:[%s2937_s26 + $0xe0] sm:$0xff] %vm1779_vm2, %v1775_v9  ;;  %v1776_v16 = vadd.f32 %v2931_v44, %v1735_v59 }
 0x3f7   : > { %1809 = vst.msk [vmem:[%s2937_s26 + $0xe8] sm:$0xff] %vm1779_vm2, %v1776_v16 }
 0x3fa   : > { %v1737_v53 = vpop.xlane.xlu0 %1736 }
 0x3fb   : > { %v1777_v10 = vadd.f32 %v2931_v44, %v1737_v53 }
 0x3fc   : > { %v1739_v63 = vpop.xlane.xlu1 %1738 }
 0x3fd   : > { %1810 = vst.msk [vmem:[%s2937_s26 + $0xf0] sm:$0xff] %vm1779_vm2, %v1777_v10  ;;  %v1778_v57 = vadd.f32 %v2931_v44, %v1739_v63 }
 0x3ff   : > { %1811 = vst.msk [vmem:[%s2937_s26 + $0xf8] sm:$0xff] %vm1779_vm2, %v1778_v57 }
 0x400 PF: > { %s22_s15 = sadd.s32 1, %s2118_s15  }
 0x401   : > { %p19_p4 = scmp.ge.s32.totalorder %s22_s15, 4  }
 0x403   :  { %21 = sbr.rel (!%p19_p4) target bundleno = 3 (0x3), region = 93 }

</bundles_post_ra>
